<compile_context>
chip_gen: v6e
topology: v6e:2x2x1
jax: 0.10.0
libtpu: 0.0.40
codegen_flags: <defaults>
</compile_context>

<pallas_src>
import jax
import jax.numpy as jnp
from jax.experimental import pallas as pl
from jax.experimental.pallas import tpu as pltpu

# ---------------- configuration (matches GNNAgent defaults) ----------------
T, B = 2, 2          # time, batch
N = 8                # nodes per graph (obj_n)
F_IN = 12            # input_dims[1]  (unary feature dim)
E = 3                # input_dims[2]  (nb_edge_types)
H = 16               # embedding_size
NET_CODE = "2g0f"    # -> 2 gnn layers, 0 dense layers, max_reduce=False
MP_ROUNDS = 1        # module references self.mp_rounds; default ctor value is 1
G = T * B
GN = G * N           # total nodes in the batched graph
KF = (E + 1) * H     # fused contraction dim: root + E relations

HIGHEST = jax.lax.Precision.HIGHEST


def parse_code(net_code):
    assert net_code[1] == "g" and net_code[-1] == "f"
    return int(net_code[0]), int(net_code[-2]), net_code[2] == "m"


NB_LAYERS, _, MAX_REDUCE = parse_code(NET_CODE)


# ------------------------------- kernel ------------------------------------
def gnn_kernel(x_ref, a_ref, w_emb_ref, b_emb_ref, w_stack_ref, b_gnn_ref,
               out_ref):
    # x_ref:      (GN, F_IN)        flat node features for all graphs
    # a_ref:      (E*GN, GN)        block-diag, mean-normalized adjacency,
    #                               relation-major along rows
    # w_emb_ref:  (F_IN, H)         embedding weight, pre-transposed
    # b_emb_ref:  (1, H)
    # w_stack_ref:(L, (E+1)*H, H)   [w_root^T; w_rel_0^T; ...] stacked per layer
    # b_gnn_ref:  (L, 1, H)
    # out_ref:    (GN, H)
    emb = jnp.dot(x_ref[...], w_emb_ref[...],
                  preferred_element_type=jnp.float32,
                  precision=HIGHEST) + b_emb_ref[...]                   # (GN,H)
    A = a_ref[...]                                                      # (E*GN,GN)

    for l in range(NB_LAYERS):          # unrolled: NB_LAYERS == 2
        for _ in range(MP_ROUNDS):
            # one MXU push aggregates every relation of every graph
            agg = jnp.dot(A, emb, preferred_element_type=jnp.float32,
                          precision=HIGHEST)                            # (E*GN,H)
            # lane-concat root features + per-relation aggregates -> K=(E+1)*H
            feat = jnp.concatenate(
                [emb] + [agg[r * GN:(r + 1) * GN] for r in range(E)],
                axis=-1)                                                # (GN,KF)
            acc = jnp.dot(feat, w_stack_ref[l],
                          preferred_element_type=jnp.float32,
                          precision=HIGHEST) + b_gnn_ref[l]
            emb = jnp.maximum(acc, 0.0)                                 # relu

    out_ref[...] = emb


# ------------------------------- wrapper ------------------------------------
@jax.jit
def gnn_agent_forward(x, adj, w_emb, b_emb, w_root, w_rel, b_gnn):
    """x: (G, N, F_IN) f32, adj: (G, E, N, N) f32 -> (G, N*H) f32."""
    # ---- trace-time preprocessing (tiny, exact f32 elementwise XLA work) ----
    # mean normalization folded into the adjacency (row scaling commutes
    # through the relation matmul)
    deg = jnp.sum(adj, axis=3, keepdims=True)                       # (G,E,N,1)
    inv = jnp.where(deg > 0.0, 1.0 / jnp.maximum(deg, 1.0), 0.0)
    adj_norm = adj * inv                                            # (G,E,N,N)

    # block-diagonal across graphs, relation-major along rows, built with an
    # exact broadcasted mask (no matmul -> no rounding of 1/deg values):
    # a_big[e*GN + g*N + i, h*N + j] = eye[g,h] * adj_norm[g,e,i,j]
    blk = jnp.eye(G, dtype=jnp.float32)[None, :, None, :, None]    # (1,G,1,G,1)
    a_big = (blk * jnp.transpose(adj_norm, (1, 0, 2, 3))[:, :, :, None, :]
             ).reshape(E * GN, GN)                                  # (E*GN,GN)

    # pre-transposed / stacked weights -> no in-kernel transposes
    w_emb_t = w_emb.T                                               # (F_IN, H)
    w_stack = jnp.concatenate(
        [jnp.transpose(w_root, (0, 2, 1))[:, None],                 # (L,1,H,H)
         jnp.transpose(w_rel, (0, 1, 3, 2))],                       # (L,E,H,H)
        axis=1).reshape(NB_LAYERS, KF, H)                           # (L,KF,H)

    x_flat = x.reshape(GN, F_IN)

    out = pl.pallas_call(
        gnn_kernel,
        out_shape=jax.ShapeDtypeStruct((GN, H), jnp.float32),
        grid_spec=pltpu.PrefetchScalarGridSpec(
            num_scalar_prefetch=0,
            grid=(1,),
            in_specs=[
                pl.BlockSpec((GN, F_IN), lambda i: (0, 0)),
                pl.BlockSpec((E * GN, GN), lambda i: (0, 0)),
                pl.BlockSpec((F_IN, H), lambda i: (0, 0)),
                pl.BlockSpec((1, H), lambda i: (0, 0)),
                pl.BlockSpec((NB_LAYERS, KF, H), lambda i: (0, 0, 0)),
                pl.BlockSpec((NB_LAYERS, 1, H), lambda i: (0, 0, 0)),
            ],
            out_specs=pl.BlockSpec((GN, H), lambda i: (0, 0)),
        ),
        compiler_params=pltpu.CompilerParams(
            dimension_semantics=("arbitrary",)),
    )(x_flat, a_big, w_emb_t, b_emb, w_stack, b_gnn)

    if MAX_REDUCE:
        return jnp.max(out.reshape(G, N, H), axis=1)    # (G, H)
    return out.reshape(G, N * H)                        # torch.flatten(x, 1, 2)


# ----------------------------- JAX reference --------------------------------
def reference(x, adj, w_emb, b_emb, w_root, w_rel, b_gnn):
    emb = jnp.einsum("gnf,hf->gnh", x, w_emb, precision=HIGHEST) + b_emb
    for l in range(NB_LAYERS):
        for _ in range(MP_ROUNDS):
            acc = jnp.einsum("gnh,oh->gno", emb, w_root[l],
                             precision=HIGHEST) + b_gnn[l]
            for r in range(E):
                A = adj[:, r]                                   # (G, N, N)
                deg = jnp.sum(A, axis=2, keepdims=True)
                inv = jnp.where(deg > 0.0, 1.0 / jnp.maximum(deg, 1.0), 0.0)
                agg = jnp.einsum("gij,gjh->gih", A, emb, precision=HIGHEST)
                acc = acc + inv * jnp.einsum("gnh,oh->gno", agg, w_rel[l, r],
                                             precision=HIGHEST)
            emb = jnp.maximum(acc, 0.0)
    if MAX_REDUCE:
        return jnp.max(emb, axis=1)
    return emb.reshape(G, N * H)


# --------------------------------- main --------------------------------------
if __name__ == "__main__":
    key = jax.random.PRNGKey(0)
    k_un, k_bin, k_we, k_be, k_wr, k_wl, k_bg = jax.random.split(key, 7)

    # obs['unary_tensor']:  (T, B, N, F_IN)
    unary = jax.random.normal(k_un, (T, B, N, F_IN), dtype=jnp.float32)
    # obs['binary_tensor']: (T, B, N, N, E) with {0, 1} entries
    binary = (jax.random.uniform(k_bin, (T, B, N, N, E)) < 0.3).astype(jnp.float32)

    # flatten(0,1) + permute(0,3,1,2) as in the torch forward
    x = unary.reshape(G, N, F_IN)
    adj = jnp.transpose(binary.reshape(G, N, N, E), (0, 3, 1, 2))  # (G, E, N, N)

    # deterministic parameter init (synthetic; not loaded from a checkpoint)
    w_emb = jax.random.normal(k_we, (H, F_IN), dtype=jnp.float32) * 0.2
    b_emb = jax.random.normal(k_be, (1, H), dtype=jnp.float32) * 0.1
    w_root = jax.random.normal(k_wr, (NB_LAYERS, H, H), dtype=jnp.float32) * 0.2
    w_rel = jax.random.normal(k_wl, (NB_LAYERS, E, H, H), dtype=jnp.float32) * 0.2
    b_gnn = jax.random.normal(k_bg, (NB_LAYERS, 1, H), dtype=jnp.float32) * 0.1

    out = gnn_agent_forward(x, adj, w_emb, b_emb, w_root, w_rel, b_gnn)
    out = jax.block_until_ready(out)

    ref = reference(x, adj, w_emb, b_emb, w_root, w_rel, b_gnn)
    assert out.shape == (G, N * H), out.shape
    assert jnp.allclose(out, ref, atol=1e-4, rtol=1e-4), \
        float(jnp.max(jnp.abs(out - ref)))

    print("KERNEL_OK")
</pallas_src>

<mosaic_0001>
module attributes {stable_mosaic.version = 11 : i64} {
  func.func @gnn_kernel(%arg0: i32, %arg1: memref<32x12xf32, #tpu.memory_space<vmem>>, %arg2: memref<96x32xf32, #tpu.memory_space<vmem>>, %arg3: memref<12x16xf32, #tpu.memory_space<vmem>>, %arg4: memref<1x16xf32, #tpu.memory_space<vmem>>, %arg5: memref<2x64x16xf32, #tpu.memory_space<vmem>>, %arg6: memref<2x1x16xf32, #tpu.memory_space<vmem>>, %arg7: memref<32x16xf32, #tpu.memory_space<vmem>>) attributes {dimension_semantics = [#tpu.dimension_semantics<arbitrary>], iteration_bounds = array<i64: 1>, scalar_prefetch = 0 : i64, scratch_operands = 0 : i64, tpu.core_type = #tpu.core_type<tc>, window_params = [{pipeline_mode = #tpu.pipeline_mode<synchronous>, transform_indices = @transform_0, window_bounds = array<i64: 32, 12>}, {pipeline_mode = #tpu.pipeline_mode<synchronous>, transform_indices = @transform_1, window_bounds = array<i64: 96, 32>}, {pipeline_mode = #tpu.pipeline_mode<synchronous>, transform_indices = @transform_2, window_bounds = array<i64: 12, 16>}, {pipeline_mode = #tpu.pipeline_mode<synchronous>, transform_indices = @transform_3, window_bounds = array<i64: 1, 16>}, {pipeline_mode = #tpu.pipeline_mode<synchronous>, transform_indices = @transform_4, window_bounds = array<i64: 2, 64, 16>}, {pipeline_mode = #tpu.pipeline_mode<synchronous>, transform_indices = @transform_5, window_bounds = array<i64: 2, 1, 16>}, {pipeline_mode = #tpu.pipeline_mode<synchronous>, transform_indices = @transform_6, window_bounds = array<i64: 32, 16>}]} {
    %c0 = arith.constant 0 : index
    %c0_0 = arith.constant 0 : index
    %0 = vector.load %arg1[%c0, %c0_0] : memref<32x12xf32, #tpu.memory_space<vmem>>, vector<32x12xf32>
    %c0_1 = arith.constant 0 : index
    %c0_2 = arith.constant 0 : index
    %1 = vector.load %arg3[%c0_1, %c0_2] : memref<12x16xf32, #tpu.memory_space<vmem>>, vector<12x16xf32>
    %cst = arith.constant dense<0.000000e+00> : vector<32x16xf32>
    %2 = tpu.matmul %0, %1, %cst {dimension_numbers = #tpu.dot_dimension_numbers<[1], [0], [0], [1], [0, 0, 1, 1], [], []>, precision = #tpu.contract_precision<fp32>} : vector<32x12xf32>, vector<12x16xf32>, vector<32x16xf32> -> vector<32x16xf32>
    %c0_3 = arith.constant 0 : index
    %c0_4 = arith.constant 0 : index
    %3 = vector.load %arg4[%c0_3, %c0_4] : memref<1x16xf32, #tpu.memory_space<vmem>>, vector<1x16xf32>
    %4 = vector.broadcast %3 : vector<1x16xf32> to vector<32x16xf32>
    %5 = arith.addf %2, %4 : vector<32x16xf32>
    %c0_5 = arith.constant 0 : index
    %c0_6 = arith.constant 0 : index
    %6 = vector.load %arg2[%c0_5, %c0_6] : memref<96x32xf32, #tpu.memory_space<vmem>>, vector<96x32xf32>
    %cst_7 = arith.constant dense<0.000000e+00> : vector<96x16xf32>
    %7 = tpu.matmul %6, %5, %cst_7 {dimension_numbers = #tpu.dot_dimension_numbers<[1], [0], [0], [1], [0, 0, 1, 1], [], []>, precision = #tpu.contract_precision<fp32>} : vector<96x32xf32>, vector<32x16xf32>, vector<96x16xf32> -> vector<96x16xf32>
    %8 = vector.extract_strided_slice %7 {offsets = [0, 0], sizes = [32, 16], strides = [1, 1]} : vector<96x16xf32> to vector<32x16xf32>
    %9 = vector.extract_strided_slice %7 {offsets = [32, 0], sizes = [32, 16], strides = [1, 1]} : vector<96x16xf32> to vector<32x16xf32>
    %10 = vector.extract_strided_slice %7 {offsets = [64, 0], sizes = [32, 16], strides = [1, 1]} : vector<96x16xf32> to vector<32x16xf32>
    %11 = tpu.concatenate %5, %8, %9, %10 in 1 : vector<32x16xf32>, vector<32x16xf32>, vector<32x16xf32>, vector<32x16xf32> -> vector<32x64xf32>
    %c0_8 = arith.constant 0 : index
    %c0_9 = arith.constant 0 : index
    %c0_10 = arith.constant 0 : index
    %12 = vector.load %arg5[%c0_8, %c0_9, %c0_10] : memref<2x64x16xf32, #tpu.memory_space<vmem>>, vector<1x64x16xf32>
    %13 = vector.shape_cast %12 : vector<1x64x16xf32> to vector<64x16xf32>
    %cst_11 = arith.constant dense<0.000000e+00> : vector<32x16xf32>
    %14 = tpu.matmul %11, %13, %cst_11 {dimension_numbers = #tpu.dot_dimension_numbers<[1], [0], [0], [1], [0, 0, 1, 1], [], []>, precision = #tpu.contract_precision<fp32>} : vector<32x64xf32>, vector<64x16xf32>, vector<32x16xf32> -> vector<32x16xf32>
    %c0_12 = arith.constant 0 : index
    %c0_13 = arith.constant 0 : index
    %c0_14 = arith.constant 0 : index
    %15 = vector.load %arg6[%c0_12, %c0_13, %c0_14] : memref<2x1x16xf32, #tpu.memory_space<vmem>>, vector<1x1x16xf32>
    %16 = vector.shape_cast %15 : vector<1x1x16xf32> to vector<1x16xf32>
    %17 = vector.broadcast %16 : vector<1x16xf32> to vector<32x16xf32>
    %18 = arith.addf %14, %17 : vector<32x16xf32>
    %cst_15 = arith.constant 0.000000e+00 : f32
    %19 = vector.broadcast %cst_15 : f32 to vector<32x16xf32>
    %20 = arith.maximumf %18, %19 : vector<32x16xf32>
    %cst_16 = arith.constant dense<0.000000e+00> : vector<96x16xf32>
    %21 = tpu.matmul %6, %20, %cst_16 {dimension_numbers = #tpu.dot_dimension_numbers<[1], [0], [0], [1], [0, 0, 1, 1], [], []>, precision = #tpu.contract_precision<fp32>} : vector<96x32xf32>, vector<32x16xf32>, vector<96x16xf32> -> vector<96x16xf32>
    %22 = vector.extract_strided_slice %21 {offsets = [0, 0], sizes = [32, 16], strides = [1, 1]} : vector<96x16xf32> to vector<32x16xf32>
    %23 = vector.extract_strided_slice %21 {offsets = [32, 0], sizes = [32, 16], strides = [1, 1]} : vector<96x16xf32> to vector<32x16xf32>
    %24 = vector.extract_strided_slice %21 {offsets = [64, 0], sizes = [32, 16], strides = [1, 1]} : vector<96x16xf32> to vector<32x16xf32>
    %25 = tpu.concatenate %20, %22, %23, %24 in 1 : vector<32x16xf32>, vector<32x16xf32>, vector<32x16xf32>, vector<32x16xf32> -> vector<32x64xf32>
    %c1 = arith.constant 1 : index
    %c0_17 = arith.constant 0 : index
    %c0_18 = arith.constant 0 : index
    %26 = vector.load %arg5[%c1, %c0_17, %c0_18] : memref<2x64x16xf32, #tpu.memory_space<vmem>>, vector<1x64x16xf32>
    %27 = vector.shape_cast %26 : vector<1x64x16xf32> to vector<64x16xf32>
    %cst_19 = arith.constant dense<0.000000e+00> : vector<32x16xf32>
    %28 = tpu.matmul %25, %27, %cst_19 {dimension_numbers = #tpu.dot_dimension_numbers<[1], [0], [0], [1], [0, 0, 1, 1], [], []>, precision = #tpu.contract_precision<fp32>} : vector<32x64xf32>, vector<64x16xf32>, vector<32x16xf32> -> vector<32x16xf32>
    %c1_20 = arith.constant 1 : index
    %c0_21 = arith.constant 0 : index
    %c0_22 = arith.constant 0 : index
    %29 = vector.load %arg6[%c1_20, %c0_21, %c0_22] : memref<2x1x16xf32, #tpu.memory_space<vmem>>, vector<1x1x16xf32>
    %30 = vector.shape_cast %29 : vector<1x1x16xf32> to vector<1x16xf32>
    %31 = vector.broadcast %30 : vector<1x16xf32> to vector<32x16xf32>
    %32 = arith.addf %28, %31 : vector<32x16xf32>
    %cst_23 = arith.constant 0.000000e+00 : f32
    %33 = vector.broadcast %cst_23 : f32 to vector<32x16xf32>
    %34 = arith.maximumf %32, %33 : vector<32x16xf32>
    %c0_24 = arith.constant 0 : index
    %c0_25 = arith.constant 0 : index
    %35 = vector.load %arg7[%c0_24, %c0_25] : memref<32x16xf32, #tpu.memory_space<vmem>>, vector<32x16xf32>
    tpu.vector_store %arg7[%c0_24, %c0_25], %34 {strides = array<i32>} : memref<32x16xf32, #tpu.memory_space<vmem>>, vector<32x16xf32>,
    return
  }
  func.func @transform_0(%arg0: i32) -> (i32, i32) {
    %c0_i32 = arith.constant 0 : i32
    %c0_i32_0 = arith.constant 0 : i32
    %c0_i32_1 = arith.constant 0 : i32
    return %c0_i32, %c0_i32_0 : i32, i32
  }
  func.func @transform_1(%arg0: i32) -> (i32, i32) {
    %c0_i32 = arith.constant 0 : i32
    %c0_i32_0 = arith.constant 0 : i32
    %c0_i32_1 = arith.constant 0 : i32
    return %c0_i32, %c0_i32_0 : i32, i32
  }
  func.func @transform_2(%arg0: i32) -> (i32, i32) {
    %c0_i32 = arith.constant 0 : i32
    %c0_i32_0 = arith.constant 0 : i32
    %c0_i32_1 = arith.constant 0 : i32
    return %c0_i32, %c0_i32_0 : i32, i32
  }
  func.func @transform_3(%arg0: i32) -> (i32, i32) {
    %c0_i32 = arith.constant 0 : i32
    %c0_i32_0 = arith.constant 0 : i32
    %c0_i32_1 = arith.constant 0 : i32
    return %c0_i32, %c0_i32_0 : i32, i32
  }
  func.func @transform_4(%arg0: i32) -> (i32, i32, i32) {
    %c0_i32 = arith.constant 0 : i32
    %c0_i32_0 = arith.constant 0 : i32
    %c0_i32_1 = arith.constant 0 : i32
    %c0_i32_2 = arith.constant 0 : i32
    return %c0_i32, %c0_i32_0, %c0_i32_1 : i32, i32, i32
  }
  func.func @transform_5(%arg0: i32) -> (i32, i32, i32) {
    %c0_i32 = arith.constant 0 : i32
    %c0_i32_0 = arith.constant 0 : i32
    %c0_i32_1 = arith.constant 0 : i32
    %c0_i32_2 = arith.constant 0 : i32
    return %c0_i32, %c0_i32_0, %c0_i32_1 : i32, i32, i32
  }
  func.func @transform_6(%arg0: i32) -> (i32, i32) {
    %c0_i32 = arith.constant 0 : i32
    %c0_i32_0 = arith.constant 0 : i32
    %c0_i32_1 = arith.constant 0 : i32
    return %c0_i32, %c0_i32_0 : i32, i32
  }
}

</mosaic_0001>

<bundles_post_ra>
// kernel: gnn_agent_forward.1
= control target key start
LH: loop header
LB: loop body
LE: loop exit
PB: predicated region body
PF: predicated region fallthrough
CT: control target
= control target key end

     0   :  { %vm49_vm0 = vcmask 1043456   ;;  %vm36_vm1 = vcmask 97280   ;;  %vm653_vm2 = vcmask 261120   ;;  %s5156_s20 = smov 16   ;;  %s5157_s21 = smov 32   ;;  %vm1696_vm3 = vcmask 130048   ;;  %s6558_s2 = inlined_call_operand.vmem [shape: f32[12,16], index: 2, kind: input, shape index: {}]   ;;  %s6559_s0 = inlined_call_operand.vmem [shape: f32[32,12], index: 0, kind: input, shape index: {}]   ;;  %s6560_s1 = inlined_call_operand.vmem [shape: f32[96,32], index: 1, kind: input, shape index: {}]   ;;  %s6561_s3 = inlined_call_operand.vmem [shape: f32[1,16], index: 3, kind: input, shape index: {}]   ;;  %s6562_s4 = inlined_call_operand.vmem [shape: f32[2,64,16], index: 4, kind: input, shape index: {}]   ;;  %s6563_s5 = inlined_call_operand.vmem [shape: f32[2,1,16], index: 5, kind: input, shape index: {}]   ;;  %s6564_s6 = inlined_call_operand.vmem [shape: f32[32,16], index: 6, kind: output, shape index: {}]  }
   0x1   :  { %v28_v0 = vld [vmem:[%s6558_s2 + $0x8] sm:$0xf]  ;;  %v27_v1 = vld [vmem:[%s6558_s2] sm:$0xff]  ;;  %v25_v7 = vld [vmem:[%s6559_s0 + $0x10] sm:$0xff]  ;;  %s5158_s22 = smov 48   ;;  %vm1705_vm4 = vcmask 392192  }
   0x2   :  { %v23_v2 = vld [vmem:[%s6559_s0] sm:$0xff]  ;;  %v51_v3 = vsel %vm49_vm0, %v28_v0, 0  ;;  %v5203_v4 = vand.u32 4294901760, %v27_v1  ;;  %v24_v6 = vld [vmem:[%s6559_s0 + $0x8] sm:$0xff]  ;;  %v26_v8 = vld [vmem:[%s6559_s0 + $0x18] sm:$0xff]  ;;  %v44_v12 = vsel %vm36_vm1, %v25_v7, 0 }
   0x3   :  { %v38_v5 = vsel %vm36_vm1, %v23_v2, 0  ;;  %v5215_v9 = vand.u32 4294901760, %v51_v3  ;;  %v41_v11 = vsel %vm36_vm1, %v24_v6, 0  ;;  %v5224_v15 = vand.u32 4294901760, %v44_v12  ;;  %v641_v41 = vld [vmem:[%s6560_s1] sm:$0xff]  ;;  %v642_v59 = vld [vmem:[%s6560_s1 + $0x8] sm:$0xff] }
   0x4   :  { %v5217_v10 = vand.u32 4294901760, %v38_v5  ;;  %v5221_v13 = vand.u32 4294901760, %v41_v11  ;;  %v197_v14 = vsub.f32 %v27_v1, %v5203_v4  ;;  %v47_v16 = vsel %vm36_vm1, %v26_v8, 0  ;;  %v4133_v49 = vld [vmem:[%s6561_s3] ss:$0 sm:$0xff] }
   0x5   :  { %4517 = vmatprep.subr.mxu0 %v5215_v9  ;;  %v190_v18 = vsub.f32 %v51_v3, %v5215_v9  ;;  %v5231_v19 = vand.u32 4294901760, %v47_v16  ;;  %v141_v22 = vsub.f32 %v44_v12, %v5224_v15  ;;  %v655_v42 = vsel %vm653_vm2, %v641_v41, 0 }
   0x6   :  { %v121_v17 = vsub.f32 %v38_v5, %v5217_v10  ;;  %4531 = vmatprep.mubr.f32.mxu1 %v5217_v10  ;;  %4518 = vmatpush3.msra.mxu0 %v5215_v9  ;;  %v131_v20 = vsub.f32 %v41_v11, %v5221_v13  ;;  %v198_v21 = vand.u32 4294901760, %v197_v14  ;;  %v5262_v43 = vand.u32 4294901760, %v655_v42 }
   0x7   :  { %4519 = vmatprep.subr.mxu0 %v5203_v4  ;;  %v191_v24 = vand.u32 4294901760, %v190_v18  ;;  %v151_v25 = vsub.f32 %v47_v16, %v5231_v19  ;;  %v142_v28 = vand.u32 4294901760, %v141_v22  ;;  %v644_v16 = vld [vmem:[%s6560_s1 + $0x18] sm:$0xff]  ;;  %vm1725_vm5 = vcmask 523264  }
   0x8   :  { %v122_v23 = vand.u32 4294901760, %v121_v17  ;;  %4520 = vmatpush3.msra.mxu0 %v5203_v4  ;;  %v132_v26 = vand.u32 4294901760, %v131_v20  ;;  %v199_v27 = vsub.f32 %v197_v14, %v198_v21  ;;  %6695 = vst [vmem:[#allocation2_spill] sm:$0xff] %v5262_v43  ;;  %v5265_v44 = vsub.f32 %v655_v42, %v5262_v43 }
   0x9   :  { %v192_v30 = vsub.f32 %v190_v18, %v191_v24  ;;  %4537 = vmatprep.subr.mxu0 %v190_v18  ;;  %v152_v31 = vand.u32 4294901760, %v151_v25  ;;  %v143_v33 = vsub.f32 %v141_v22, %v142_v28 }
   0xa   :  { %v123_v29 = vsub.f32 %v121_v17, %v122_v23  ;;  %v133_v32 = vsub.f32 %v131_v20, %v132_v26  ;;  %v200_v36 = vand.u32 4294901760, %v199_v27  ;;  %6696 = vst [vmem:[#allocation3_spill] sm:$0xff] %v5265_v44  ;;  %v5269_v45 = vand.u32 4294901760, %v5265_v44 }
   0xb   :  { %v193_v35 = vand.u32 4294901760, %v192_v30  ;;  %v153_v37 = vsub.f32 %v151_v25, %v152_v31  ;;  %v144_v39 = vand.u32 4294901760, %v143_v33 }
   0xc   :  { %v124_v34 = vand.u32 4294901760, %v123_v29  ;;  %v134_v38 = vand.u32 4294901760, %v133_v32  ;;  %6697 = vst [vmem:[#allocation4_spill] sm:$0xff] %v5269_v45  ;;  %v762_v46 = vsub.f32 %v5265_v44, %v5269_v45 }
   0xd   :  { %4527 = vmatprep.subr.mxu1 %v193_v35  ;;  %v154_v40 = vand.u32 4294901760, %v153_v37 }
   0xe   :  { %4521 = vmatprep.mubr.f32.mxu0 %v124_v34  ;;  %4528 = vmatpush3.msra.mxu1 %v193_v35  ;;  %v5273_v47 = vand.u32 4294901760, %v762_v46  ;;  %v647_v46 = vld [vmem:[%s6560_s1 + $0x30] sm:$0xff] }
   0xf   :  { %4522 = vmatmul.mubr.f32.vlgmr.msra.gmra.mxu0 %v134_v38  ;;  %4529 = vmatprep.subr.mxu1 %v200_v36 }
  0x10   :  { %4538 = vmatpush3.msra.mxu0 %v190_v18  ;;  %4530 = vmatpush3.msra.mxu1 %v200_v36  ;;  %6698 = vst [vmem:[#allocation5_spill] sm:$0xff] %v5273_v47 }
  0x11   :  { %4524 = vmatprep.mubr.f32.mxu0 %v144_v39  ;;  %4532 = vmatmul.mubr.f32.vlgmr.msra.gmra.mxu1 %v5221_v13 }
  0x12   :  { %4547 = vmatprep.subr.mxu1 %v5215_v9  ;;  %4539 = vmatprep.subr.mxu0 %v197_v14 }
  0x13   :  { %4525 = vmatmul.mubr.f32.gmra.mxu0 %v154_v40  ;;  %4548 = vmatpush3.msra.mxu1 %v5215_v9 }
  0x14   :  { %4534 = vmatprep.mubr.f32.mxu1 %v5224_v15  ;;  %4540 = vmatpush3.msra.mxu0 %v197_v14 }
  0x15   :  { %4541 = vmatprep.mubr.f32.mxu0 %v121_v17  ;;  %4535 = vmatmul.mubr.f32.gmra.mxu1 %v5231_v19 }
  0x16   :  { %4549 = vmatprep.subr.mxu1 %v5203_v4  ;;  %4557 = vmatprep.subr.mxu0 %v191_v24 }
  0x17   :  { %4542 = vmatmul.mubr.f32.vlgmr.msra.gmra.mxu0 %v131_v20  ;;  %4550 = vmatpush3.msra.mxu1 %v5203_v4 }
  0x18   :  { %4551 = vmatprep.mubr.f32.mxu1 %v122_v23  ;;  %4558 = vmatpush3.msra.mxu0 %v191_v24  ;;  %v645_v23 = vld [vmem:[%s6560_s1 + $0x20] sm:$0xff] }
  0x19   :  { %4544 = vmatprep.mubr.f32.mxu0 %v141_v22  ;;  %4552 = vmatmul.mubr.f32.vlgmr.msra.gmra.mxu1 %v132_v26  ;;  %v664_v26 = vsel %vm653_vm2, %v644_v16, 0  ;;  %v667_v34 = vsel %vm653_vm2, %v645_v23, 0 }
  0x1a   :  { %4567 = vmatprep.subr.mxu1 %v5215_v9  ;;  %4559 = vmatprep.subr.mxu0 %v198_v21  ;;  %v5307_v38 = vand.u32 4294901760, %v664_v26 }
  0x1b   :  { %4545 = vmatmul.mubr.f32.gmra.mxu0 %v151_v25  ;;  %4568 = vmatpush3.msra.mxu1 %v5215_v9  ;;  %v643_v9 = vld [vmem:[%s6560_s1 + $0x10] sm:$0xff] }
  0x1c   :  { %4554 = vmatprep.mubr.f32.mxu1 %v142_v28  ;;  %4560 = vmatpush3.msra.mxu0 %v198_v21  ;;  %v661_v18 = vsel %vm653_vm2, %v643_v9, 0  ;;  %6703 = vst [vmem:[#allocation10_spill] sm:$0xff] %v5307_v38 }
  0x1d   :  { %4561 = vmatprep.mubr.f32.mxu0 %v5217_v10  ;;  %4555 = vmatmul.mubr.f32.gmra.mxu1 %v152_v31  ;;  %v5299_v30 = vand.u32 4294901760, %v661_v18  ;;  %v646_v31 = vld [vmem:[%s6560_s1 + $0x28] sm:$0xff] }
  0x1e   :  { %4569 = vmatprep.subr.mxu1 %v5203_v4  ;;  %4571 = vmatprep.mubr.f32.mxu1 %v5217_v10  ;;  %v670_v42 = vsel %vm653_vm2, %v646_v31, 0 }
  0x1f   :  { %4562 = vmatmul.mubr.f32.vlgmr.msra.gmra.mxu0 %v5221_v13  ;;  %4570 = vmatpush3.msra.mxu1 %v5203_v4  ;;  %v658_v4 = vsel %vm653_vm2, %v642_v59, 0  ;;  %6701 = vst [vmem:[#allocation8_spill] sm:$0xff] %v5299_v30  ;;  %v673_v59 = vsel %vm653_vm2, %v647_v46, 0 }
  0x20   :  { %4564 = vmatprep.mubr.f32.mxu0 %v5224_v15  ;;  %v5286_v11 = vand.u32 4294901760, %v658_v4 }
  0x21   :  { %4572 = vmatmul.mubr.f32.vlgmr.msra.gmra.mxu1 %v5221_v13 }
  0x22   :  { %4574 = vmatprep.mubr.f32.mxu1 %v5224_v15  ;;  %6699 = vst [vmem:[#allocation6_spill] sm:$0xff] %v5286_v11  ;;  %v5296_v25 = vsub.f32 %v658_v4, %v5286_v11 }
  0x23   :  { %4565 = vmatmul.mubr.f32.gmra.mxu0 %v5231_v19 }
  0x24   :  { %4585 = vmatprep.mubr.f32.mxu0 %v5273_v47  ;;  %6700 = vst [vmem:[#allocation7_spill] sm:$0xff] %v5296_v25  ;;  %v5312_v41 = vand.u32 4294901760, %v5296_v25 }
  0x25   :  { %4575 = vmatmul.mubr.f32.gmra.mxu1 %v5231_v19 }
  0x26   :  { %4611 = vmatprep.mubr.f32.mxu1 %v5262_v43  ;;  %6705 = vst [vmem:[#allocation12_spill] sm:$0xff] %v5312_v41 }
  0xcf   :  { %v4523_v48 = vpop.f32.mrf.mxu0 }
  0xd0   :  { %v137_v53 = vadd.f32 %v4523_v48, %v4133_v49 }
  0xd1   :  { %v126_v50 = vpop.f32.mrf.mxu0  ;;  %v4533_v51 = vpop.f32.mrf.mxu1 }
  0xd2   :  { %v127_v56 = vadd.f32 %v4133_v49, %v126_v50  ;;  %v244_v60 = vadd.f32 %v4533_v51, %v137_v53  ;;  %v5322_v51 = vsub.f32 %v661_v18, %v5299_v30 }
  0xd3   :  { %v4526_v52 = vpop.f32.mrf.mxu0  ;;  %v237_v54 = vpop.f32.mrf.mxu1 }
  0xd4   :  { %v157_v61 = vadd.f32 %v4526_v52, %v4133_v49  ;;  %v238_v0 = vadd.f32 %v237_v54, %v127_v56  ;;  %6706 = vst [vmem:[#allocation13_spill] sm:$0xff] %v5322_v51  ;;  %v5324_v52 = vand.u32 4294901760, %v667_v34  ;;  %v648_v54 = vld [vmem:[%s6560_s1 + $0x38] sm:$0xff] }
  0xd5   :  { %v146_v55 = vpop.f32.mrf.mxu0  ;;  %v4536_v57 = vpop.f32.mrf.mxu1 }
  0xd6   :  { %v147_v1 = vadd.f32 %v4133_v49, %v146_v55  ;;  %v256_v6 = vadd.f32 %v4536_v57, %v157_v61  ;;  %6707 = vst [vmem:[#allocation14_spill] sm:$0xff] %v5324_v52  ;;  %v5335_v57 = vsub.f32 %v664_v26, %v5307_v38 }
  0xd7   :  { %v4543_v58 = vpop.f32.mrf.mxu0  ;;  %v249_v62 = vpop.f32.mrf.mxu1 }
  0xd8   :  { %v339_v2 = vadd.f32 %v4543_v58, %v244_v60  ;;  %v250_v12 = vadd.f32 %v249_v62, %v147_v1  ;;  %6709 = vst [vmem:[#allocation16_spill] sm:$0xff] %v5335_v57  ;;  %v5337_v58 = vand.u32 4294901760, %v670_v42  ;;  %v772_v62 = vsub.f32 %v5296_v25, %v5312_v41 }
  0xd9   :  { %v331_v63 = vpop.f32.mrf.mxu0  ;;  %v4553_v3 = vpop.f32.mrf.mxu1  ;;  %v5355_v1 = vand.u32 4294901760, %v5322_v51  ;;  %v5378_v9 = vand.u32 4294901760, %v5335_v57 }
  0xda   :  { %v332_v7 = vadd.f32 %v331_v63, %v238_v0  ;;  %v436_v13 = vadd.f32 %v4553_v3, %v339_v2  ;;  %6710 = vst [vmem:[#allocation17_spill] sm:$0xff] %v5337_v58  ;;  %v649_v63 = vld [vmem:[%s6560_s1 + $0x40] sm:$0xff]  ;;  %v5358_v2 = vsub.f32 %v667_v34, %v5324_v52  ;;  %v676_v3 = vsel %vm653_vm2, %v648_v54, 0 }
  0xdb   :  { %v4546_v5 = vpop.f32.mrf.mxu0  ;;  %v427_v8 = vpop.f32.mrf.mxu1  ;;  %6712 = vst [vmem:[#allocation19_spill] sm:$0xff] %v5355_v1  ;;  %6715 = vst [vmem:[#allocation22_spill] sm:$0xff] %v5378_v9  ;;  %v5391_v16 = vand.u32 4294901760, %v676_v3  ;;  %v782_v18 = vsub.f32 %v5322_v51, %v5355_v1 }
  0xdc   :  { %v353_v14 = vadd.f32 %v4546_v5, %v256_v6  ;;  %v428_v19 = vadd.f32 %v427_v8, %v332_v7  ;;  %6713 = vst [vmem:[#allocation20_spill] sm:$0xff] %v5358_v2  ;;  %v5367_v6 = vand.u32 4294901760, %v673_v59  ;;  %v650_v7 = vld [vmem:[%s6560_s1 + $0x48] sm:$0xff] }
  0xdd   :  { %v345_v10 = vpop.f32.mrf.mxu0  ;;  %v4556_v15 = vpop.f32.mrf.mxu1  ;;  %6718 = vst [vmem:[#allocation25_spill] sm:$0xff] %v5391_v16 }
  0xde   :  { %v346_v20 = vadd.f32 %v345_v10, %v250_v12  ;;  %v452_v27 = vadd.f32 %v4556_v15, %v353_v14  ;;  %6714 = vst [vmem:[#allocation21_spill] sm:$0xff] %v5367_v6  ;;  %v5381_v10 = vsub.f32 %v670_v42, %v5337_v58  ;;  %v679_v12 = vsel %vm653_vm2, %v649_v63, 0 }
  0xdf   :  { %v4563_v17 = vpop.f32.mrf.mxu0  ;;  %v443_v22 = vpop.f32.mrf.mxu1  ;;  %v5387_v14 = vand.u32 4294901760, %v772_v62  ;;  %v5413_v26 = vand.u32 4294901760, %v679_v12 }
  0xe0   :  { %v535_v21 = vadd.f32 %v4563_v17, %v436_v13  ;;  %v444_v35 = vadd.f32 %v443_v22, %v346_v20  ;;  %6716 = vst [vmem:[#allocation23_spill] sm:$0xff] %v5381_v10  ;;  %v651_v17 = vld [vmem:[%s6560_s1 + $0x50] sm:$0xff]  ;;  %v5403_v20 = vand.u32 4294901760, %v5358_v2  ;;  %v5425_v31 = vand.u32 4294901760, %v5381_v10 }
  0xe1   :  { %v528_v24 = vpop.f32.mrf.mxu0  ;;  %v4573_v29 = vpop.f32.mrf.mxu1  ;;  %6717 = vst [vmem:[#allocation24_spill] sm:$0xff] %v5387_v14  ;;  %6721 = vst [vmem:[#allocation28_spill] sm:$0xff] %v5413_v26 }
  0xe2   :  { %v529_v28 = vadd.f32 %v528_v24, %v428_v19  ;;  %v5304_v32 = vadd.f32 %v4573_v29, %v535_v21  ;;  %6719 = vst [vmem:[#allocation26_spill] sm:$0xff] %v5403_v20  ;;  %v682_v21 = vsel %vm653_vm2, %v650_v7, 0  ;;  %v5411_v24 = vsub.f32 %v673_v59, %v5367_v6  ;;  %6722 = vst [vmem:[#allocation29_spill] sm:$0xff] %v5425_v31 }
  0xe3   :  { %v4566_v33 = vpop.f32.mrf.mxu0  ;;  %v619_v37 = vpop.f32.mrf.mxu1  ;;  %v802_v46 = vsub.f32 %v5358_v2, %v5403_v20 }
  0xe4   :  { %6702 = vst [vmem:[#allocation9_spill] sm:$0xff] %v5304_v32  ;;  %v547_v36 = vadd.f32 %v4566_v33, %v452_v27  ;;  %v5309_v39 = vadd.f32 %v619_v37, %v529_v28  ;;  %v5319_v48 = vand.u32 4294901760, %v5304_v32  ;;  %6720 = vst [vmem:[#allocation27_spill] sm:$0xff] %v5411_v24  ;;  %v652_v27 = vld [vmem:[%s6560_s1 + $0x58] sm:$0xff]  ;;  %v792_v28 = vsub.f32 %v5335_v57, %v5378_v9 }
  0xe5   :  { %v540_v40 = vpop.f32.mrf.mxu0  ;;  %v4576_v50 = vpop.f32.mrf.mxu1  ;;  %v685_v33 = vsel %vm653_vm2, %v651_v17, 0  ;;  %v5433_v37 = vand.u32 4294901760, %v682_v21  ;;  %v5445_v54 = vand.u32 4294901760, %v5411_v24 }
  0xe6   :  { %6704 = vst [vmem:[#allocation11_spill] sm:$0xff] %v5309_v39  ;;  %v541_v49 = vadd.f32 %v540_v40, %v444_v35  ;;  %v5326_v53 = vadd.f32 %v4576_v50, %v547_v36  ;;  %v5332_v55 = vand.u32 4294901760, %v5309_v39  ;;  %v5352_v0 = vsub.f32 %v5304_v32, %v5319_v48 }
  0xe7   :  { %v631_v56 = vpop.f32.mrf.mxu1  ;;  %v5431_v36 = vsub.f32 %v676_v3, %v5391_v16  ;;  %6724 = vst [vmem:[#allocation31_spill] sm:$0xff] %v5433_v37  ;;  %v5436_v40 = vand.u32 4294901760, %v782_v18  ;;  %6726 = vst [vmem:[#allocation33_spill] sm:$0xff] %v5445_v54  ;;  %v5450_v59 = vand.u32 4294901760, %v685_v33  ;;  %v5452_v62 = vand.u32 4294901760, %v792_v28 }
  0xe8   :  { %6708 = vst [vmem:[#allocation15_spill] sm:$0xff] %v5326_v53  ;;  %v5341_v60 = vand.u32 4294901760, %v5326_v53  ;;  %v5343_v61 = vadd.f32 %v631_v56, %v541_v49  ;;  %v5374_v8 = vsub.f32 %v5309_v39, %v5332_v55  ;;  %v5400_v19 = vand.u32 4294901760, %v5352_v0 }
  0xe9   :  { %6723 = vst [vmem:[#allocation30_spill] sm:$0xff] %v5431_v36  ;;  %6725 = vst [vmem:[#allocation32_spill] sm:$0xff] %v5436_v40  ;;  %v688_v49 = vsel %vm653_vm2, %v652_v27, 0  ;;  %v5448_v56 = vsub.f32 %v679_v12, %v5413_v26  ;;  %v812_v3 = vsub.f32 %v5381_v10, %v5425_v31  ;;  %v5459_v7 = vand.u32 4294901760, %v5431_v36 }
  0xea   :  { %6711 = vst [vmem:[#allocation18_spill] sm:$0xff] %v5343_v61  ;;  %v905_v4 = vsub.f32 %v5326_v53, %v5341_v60  ;;  %v5364_v5 = vand.u32 4294901760, %v5343_v61  ;;  %4577 = vmatprep.subr.mxu0 %v5341_v60  ;;  %v5422_v29 = vand.u32 4294901760, %v5374_v8  ;;  %v921_v42 = vsub.f32 %v5352_v0, %v5400_v19  ;;  %6728 = vst [vmem:[#allocation35_spill] sm:$0xff] %v5450_v59 }
  0xeb   :  { %4578 = vmatpush3.msra.mxu0 %v5341_v60  ;;  %6727 = vst [vmem:[#allocation34_spill] sm:$0xff] %v5448_v56  ;;  %6729 = vst [vmem:[#allocation36_spill] sm:$0xff] %v5452_v62  ;;  %v5462_v12 = vsub.f32 %v682_v21, %v5433_v37  ;;  %v5464_v17 = vand.u32 4294901760, %v688_v49  ;;  %v5472_v27 = vand.u32 4294901760, %v5448_v56  ;;  %v5475_v28 = vsub.f32 %v685_v33, %v5450_v59 }
  0xec   :  { %v912_v13 = vsub.f32 %v5343_v61, %v5364_v5  ;;  %4579 = vmatprep.subr.mxu0 %v5364_v5  ;;  %v5389_v15 = vand.u32 4294901760, %v905_v4  ;;  %v928_v63 = vsub.f32 %v5374_v8, %v5422_v29  ;;  %6730 = vst [vmem:[#allocation37_spill] sm:$0xff] %v5459_v7  ;;  %v922_v18 = vand.u32 4294901760, %v921_v42 }
  0xed   :  { %4580 = vmatpush3.msra.mxu0 %v5364_v5  ;;  %6731 = vst [vmem:[#allocation38_spill] sm:$0xff] %v5462_v12  ;;  %6732 = vst [vmem:[#allocation39_spill] sm:$0xff] %v5464_v17  ;;  %v5487_v42 = vsub.f32 %v688_v49, %v5464_v17 }
  0xee   :  { %4581 = vmatprep.subr.mxu0 %v5319_v48  ;;  %v907_v22 = vsub.f32 %v905_v4, %v5389_v15  ;;  %v5408_v23 = vand.u32 4294901760, %v912_v13  ;;  %6734 = vst [vmem:[#allocation41_spill] sm:$0xff] %v5472_v27  ;;  %6735 = vst [vmem:[#allocation42_spill] sm:$0xff] %v5475_v28  ;;  %v929_v21 = vand.u32 4294901760, %v928_v63 }
  0xef   :  { %4582 = vmatpush3.msra.mxu0 %v5319_v48  ;;  %6738 = vst [vmem:[#allocation45_spill] sm:$0xff] %v5487_v42  ;;  %v5507_v63 = vand.u32 4294901760, %v5487_v42 }
  0xf0   :  { %4583 = vmatprep.subr.mxu0 %v5332_v55  ;;  %v908_v34 = vand.u32 4294901760, %v907_v22  ;;  %v914_v35 = vsub.f32 %v912_v13, %v5408_v23  ;;  %v5467_v22 = vand.u32 4294901760, %v802_v46  ;;  %v842_v46 = vsub.f32 %v5448_v56, %v5472_v27 }
  0xf1   :  { %4584 = vmatpush3.msra.mxu0 %v5332_v55  ;;  %6742 = vst [vmem:[#allocation49_spill] sm:$0xff] %v5507_v63 }
  0xf2   :  { %4586 = vmatmul.mubr.f32.vlgmr.msra.gmra.mxu0 %v5387_v14  ;;  %4603 = vmatprep.subr.mxu1 %v908_v34  ;;  %v915_v50 = vand.u32 4294901760, %v914_v35  ;;  %6733 = vst [vmem:[#allocation40_spill] sm:$0xff] %v5467_v22  ;;  %v5484_v35 = vand.u32 4294901760, %v5462_v12 }
  0xf3   :  { %4629 = vmatprep.subr.mxu0 %v905_v4  ;;  %4604 = vmatpush3.msra.mxu1 %v908_v34  ;;  %v5479_v34 = vand.u32 4294901760, %v812_v3 }
  0xf4   :  { %4630 = vmatpush3.msra.mxu0 %v905_v4  ;;  %4605 = vmatprep.subr.mxu1 %v915_v50  ;;  %v822_v4 = vsub.f32 %v5411_v24, %v5445_v54  ;;  %6737 = vst [vmem:[#allocation44_spill] sm:$0xff] %v5484_v35  ;;  %v852_v49 = vsub.f32 %v5462_v12, %v5484_v35 }
  0xf5   :  { %4631 = vmatprep.subr.mxu0 %v912_v13  ;;  %4588 = vmatprep.mubr.f32.mxu0 %v5436_v40  ;;  %6736 = vst [vmem:[#allocation43_spill] sm:$0xff] %v5479_v34 }
  0xf6   :  { %4606 = vmatpush3.msra.mxu1 %v915_v50  ;;  %4632 = vmatpush3.msra.mxu0 %v912_v13  ;;  %v832_v13 = vsub.f32 %v5431_v36, %v5459_v7  ;;  %v5492_v33 = vand.u32 4294901760, %v822_v4  ;;  %v5497_v50 = vand.u32 4294901760, %v5475_v28  ;;  %v872_v4 = vsub.f32 %v5487_v42, %v5507_v63 }
  0xf7   :  { %4589 = vmatmul.mubr.f32.gmra.mxu0 %v5452_v62  ;;  %4607 = vmatprep.subr.mxu1 %v922_v18 }
  0xf8   :  { %4633 = vmatprep.subr.mxu0 %v5352_v0  ;;  %4608 = vmatpush3.msra.mxu1 %v922_v18  ;;  %6739 = vst [vmem:[#allocation46_spill] sm:$0xff] %v5492_v33  ;;  %6740 = vst [vmem:[#allocation47_spill] sm:$0xff] %v5497_v50  ;;  %v862_v3 = vsub.f32 %v5475_v28, %v5497_v50  ;;  %v5521_v18 = vand.u32 4294901760, %v852_v49 }
  0xf9   :  { %4634 = vmatpush3.msra.mxu0 %v5352_v0  ;;  %4609 = vmatprep.subr.mxu1 %v929_v21  ;;  %v5502_v0 = vand.u32 4294901760, %v832_v13  ;;  %v5535_v13 = vand.u32 4294901760, %v872_v4 }
  0xfa   :  { %4635 = vmatprep.subr.mxu0 %v5374_v8  ;;  %4591 = vmatprep.mubr.f32.mxu0 %v5467_v22  ;;  %6744 = vst [vmem:[#allocation51_spill] sm:$0xff] %v5521_v18  ;;  %v1714_v22 = vld [vmem:[%s6562_s4 + $0x20] sm:$0xff] }
  0xfb   :  { %4610 = vmatpush3.msra.mxu1 %v929_v21  ;;  %4636 = vmatpush3.msra.mxu0 %v5374_v8  ;;  %6741 = vst [vmem:[#allocation48_spill] sm:$0xff] %v5502_v0  ;;  %v5513_v8 = vand.u32 4294901760, %v842_v46  ;;  %v5529_v21 = vand.u32 4294901760, %v862_v3  ;;  %6746 = vst [vmem:[#allocation53_spill] sm:$0xff] %v5535_v13  ;;  %v5733_v61 = vand.u32 4294901760, %v1714_v22 }
  0xfc   :  { %4592 = vmatmul.mubr.f32.gmra.mxu0 %v5479_v34  ;;  %4612 = vmatmul.mubr.f32.vlgmr.msra.gmra.mxu1 %v5286_v11 }
  0xfd   :  { %4655 = vmatprep.subr.mxu1 %v5341_v60  ;;  %4681 = vmatprep.subr.mxu0 %v5389_v15  ;;  %6743 = vst [vmem:[#allocation50_spill] sm:$0xff] %v5513_v8  ;;  %6745 = vst [vmem:[#allocation52_spill] sm:$0xff] %v5529_v21 }
  0xfe   :  { %4656 = vmatpush3.msra.mxu1 %v5341_v60  ;;  %4594 = vmatprep.mubr.f32.mxu0 %v5492_v33  ;;  %6754 = vst [vmem:[#allocation61_spill] sm:$0xff] %v5733_v61 }
  0xff   :  { %4657 = vmatprep.subr.mxu1 %v5364_v5  ;;  %4614 = vmatprep.mubr.f32.mxu1 %v5299_v30 }
 0x100   :  { %4658 = vmatpush3.msra.mxu1 %v5364_v5  ;;  %4595 = vmatmul.mubr.f32.gmra.mxu0 %v5502_v0  ;;  %v1715_v0 = vld [vmem:[%s6562_s4 + $0x28] sm:$0xff] }
 0x101   :  { %4615 = vmatmul.mubr.f32.gmra.mxu1 %v5307_v38  ;;  %4659 = vmatprep.subr.mxu1 %v5319_v48 }
 0x102   :  { %4660 = vmatpush3.msra.mxu1 %v5319_v48  ;;  %4597 = vmatprep.mubr.f32.mxu0 %v5513_v8 }
 0x103   :  { %4661 = vmatprep.subr.mxu1 %v5332_v55  ;;  %4617 = vmatprep.mubr.f32.mxu1 %v5324_v52 }
 0x104   :  { %4662 = vmatpush3.msra.mxu1 %v5332_v55  ;;  %4598 = vmatmul.mubr.f32.gmra.mxu0 %v5521_v18 }
 0x105   :  { %4618 = vmatmul.mubr.f32.gmra.mxu1 %v5337_v58  ;;  %4707 = vmatprep.subr.mxu1 %v5341_v60 }
 0x106   :  { %4600 = vmatprep.mubr.f32.mxu0 %v5529_v21  ;;  %4620 = vmatprep.mubr.f32.mxu1 %v5367_v6 }
 0x108   :  { %4601 = vmatmul.mubr.f32.gmra.mxu0 %v5535_v13 }
 0x109   :  { %4621 = vmatmul.mubr.f32.gmra.mxu1 %v5391_v16  ;;  %4637 = vmatprep.mubr.f32.mxu0 %v5265_v44 }
 0x10a   :  { %4623 = vmatprep.mubr.f32.mxu1 %v5413_v26 }
 0x10c   :  { %4638 = vmatmul.mubr.f32.vlgmr.msra.gmra.mxu0 %v5296_v25 }
 0x10d   :  { %4624 = vmatmul.mubr.f32.gmra.mxu1 %v5433_v37  ;;  %4682 = vmatpush3.msra.mxu0 %v5389_v15 }
 0x10e   :  { %4683 = vmatprep.subr.mxu0 %v5408_v23  ;;  %4626 = vmatprep.mubr.f32.mxu1 %v5450_v59 }
 0x10f   :  { %4684 = vmatpush3.msra.mxu0 %v5408_v23  ;;  %4640 = vmatprep.mubr.f32.mxu0 %v5322_v51 }
 0x110   :  { %4685 = vmatprep.subr.mxu0 %v5400_v19  ;;  %4641 = vmatmul.mubr.f32.gmra.mxu0 %v5335_v57 }
 0x111   :  { %4627 = vmatmul.mubr.f32.gmra.mxu1 %v5464_v17  ;;  %4686 = vmatpush3.msra.mxu0 %v5400_v19 }
 0x112   :  { %4687 = vmatprep.subr.mxu0 %v5422_v29  ;;  %4643 = vmatprep.mubr.f32.mxu0 %v5358_v2 }
 0x113   :  { %4688 = vmatpush3.msra.mxu0 %v5422_v29  ;;  %4663 = vmatprep.mubr.f32.mxu1 %v5269_v45 }
 0x114   :  { %4644 = vmatmul.mubr.f32.gmra.mxu0 %v5381_v10 }
 0x115   :  { %4664 = vmatmul.mubr.f32.vlgmr.msra.gmra.mxu1 %v5312_v41  ;;  %4646 = vmatprep.mubr.f32.mxu0 %v5411_v24 }
 0x116   :  { %4708 = vmatpush3.msra.mxu1 %v5341_v60  ;;  %4666 = vmatprep.mubr.f32.mxu1 %v5355_v1 }
 0x117   :  { %4709 = vmatprep.subr.mxu1 %v5364_v5 }
 0x118   :  { %4710 = vmatpush3.msra.mxu1 %v5364_v5  ;;  %4647 = vmatmul.mubr.f32.gmra.mxu0 %v5431_v36 }
 0x119   :  { %4711 = vmatprep.subr.mxu1 %v5319_v48  ;;  %4667 = vmatmul.mubr.f32.gmra.mxu1 %v5378_v9 }
 0x11a   :  { %4712 = vmatpush3.msra.mxu1 %v5319_v48  ;;  %4649 = vmatprep.mubr.f32.mxu0 %v5448_v56 }
 0x11b   :  { %4713 = vmatprep.subr.mxu1 %v5332_v55  ;;  %4669 = vmatprep.mubr.f32.mxu1 %v5403_v20 }
 0x11c   :  { %4714 = vmatpush3.msra.mxu1 %v5332_v55  ;;  %4650 = vmatmul.mubr.f32.gmra.mxu0 %v5462_v12 }
 0x11d   :  { %4670 = vmatmul.mubr.f32.gmra.mxu1 %v5425_v31  ;;  %4652 = vmatprep.mubr.f32.mxu0 %v5475_v28 }
 0x11e   :  { %4672 = vmatprep.mubr.f32.mxu1 %v5445_v54 }
 0x120   :  { %4653 = vmatmul.mubr.f32.gmra.mxu0 %v5487_v42 }
 0x121   :  { %4673 = vmatmul.mubr.f32.gmra.mxu1 %v5459_v7  ;;  %4689 = vmatprep.mubr.f32.mxu0 %v5262_v43 }
 0x122   :  { %4675 = vmatprep.mubr.f32.mxu1 %v5472_v27 }
 0x124   :  { %4690 = vmatmul.mubr.f32.vlgmr.msra.gmra.mxu0 %v5286_v11 }
 0x125   :  { %4676 = vmatmul.mubr.f32.gmra.mxu1 %v5484_v35  ;;  %4692 = vmatprep.mubr.f32.mxu0 %v5299_v30 }
 0x126   :  { %4678 = vmatprep.mubr.f32.mxu1 %v5497_v50 }
 0x128   :  { %4693 = vmatmul.mubr.f32.gmra.mxu0 %v5307_v38 }
 0x129   :  { %4679 = vmatmul.mubr.f32.gmra.mxu1 %v5507_v63  ;;  %4695 = vmatprep.mubr.f32.mxu0 %v5324_v52 }
 0x12a   :  { %4715 = vmatprep.mubr.f32.mxu1 %v5262_v43 }
 0x12c   :  { %4696 = vmatmul.mubr.f32.gmra.mxu0 %v5337_v58 }
 0x12d   :  { %4716 = vmatmul.mubr.f32.vlgmr.msra.gmra.mxu1 %v5286_v11  ;;  %4698 = vmatprep.mubr.f32.mxu0 %v5367_v6 }
 0x12e   :  { %4718 = vmatprep.mubr.f32.mxu1 %v5299_v30 }
 0x130   :  { %4699 = vmatmul.mubr.f32.gmra.mxu0 %v5391_v16 }
 0x131   :  { %4719 = vmatmul.mubr.f32.gmra.mxu1 %v5307_v38  ;;  %4701 = vmatprep.mubr.f32.mxu0 %v5413_v26 }
 0x132   :  { %4721 = vmatprep.mubr.f32.mxu1 %v5324_v52 }
 0x134   :  { %4702 = vmatmul.mubr.f32.gmra.mxu0 %v5433_v37 }
 0x135   :  { %4722 = vmatmul.mubr.f32.gmra.mxu1 %v5337_v58  ;;  %4704 = vmatprep.mubr.f32.mxu0 %v5450_v59  ;;  %v1716_v58 = vld [vmem:[%s6562_s4 + $0x30] sm:$0xff] }
 0x136   :  { %4724 = vmatprep.mubr.f32.mxu1 %v5367_v6  ;;  %v5699_v8 = vand.u32 4294901760, %v1716_v58 }
 0x138   :  { %4705 = vmatmul.mubr.f32.gmra.mxu0 %v5464_v17  ;;  %6748 = vst [vmem:[#allocation55_spill] sm:$0xff] %v5699_v8  ;;  %v5711_v11 = vsub.f32 %v1716_v58, %v5699_v8 }
 0x139   :  { %4725 = vmatmul.mubr.f32.gmra.mxu1 %v5391_v16  ;;  %v1717_v16 = vld [vmem:[%s6562_s4 + $0x38] sm:$0xff] }
 0x13a   :  { %4727 = vmatprep.mubr.f32.mxu1 %v5413_v26  ;;  %v5686_v6 = vand.u32 4294901760, %v1717_v16  ;;  %6750 = vst [vmem:[#allocation57_spill] sm:$0xff] %v5711_v11  ;;  %v5725_v58 = vand.u32 4294901760, %v5711_v11 }
 0x13c   :  { %v5696_v52 = vsub.f32 %v1717_v16, %v5686_v6  ;;  %4733 = vmatprep.subr.mxu0 %v5686_v6  ;;  %v5714_v16 = vand.u32 4294901760, %v1715_v0  ;;  %6752 = vst [vmem:[#allocation59_spill] sm:$0xff] %v5725_v58 }
 0x13d   :  { %4728 = vmatmul.mubr.f32.gmra.mxu1 %v5433_v37  ;;  %4734 = vmatpush3.msra.mxu0 %v5686_v6 }
 0x13e   :  { %4730 = vmatprep.mubr.f32.mxu1 %v5450_v59  ;;  %v5708_v33 = vand.u32 4294901760, %v5696_v52  ;;  %4735 = vmatprep.subr.mxu0 %v5699_v8  ;;  %6751 = vst [vmem:[#allocation58_spill] sm:$0xff] %v5714_v16  ;;  %v5728_v47 = vsub.f32 %v1715_v0, %v5714_v16  ;;  %v1878_v0 = vsub.f32 %v5711_v11, %v5725_v58 }
 0x13f   :  { %4736 = vmatpush3.msra.mxu0 %v5699_v8 }
 0x140   :  { %6749 = vst [vmem:[#allocation56_spill] sm:$0xff] %v5708_v33  ;;  %v1871_v14 = vsub.f32 %v5696_v52, %v5708_v33  ;;  %6753 = vst [vmem:[#allocation60_spill] sm:$0xff] %v5728_v47  ;;  %4737 = vmatprep.subr.mxu0 %v5714_v16  ;;  %v5744_v8 = vand.u32 4294901760, %v5728_v47  ;;  %v1879_v58 = vand.u32 4294901760, %v1878_v0 }
 0x141   :  { %4731 = vmatmul.mubr.f32.gmra.mxu1 %v5464_v17  ;;  %4738 = vmatpush3.msra.mxu0 %v5714_v16  ;;  %v5751_v16 = vsub.f32 %v1714_v22, %v5733_v61 }
 0x142   :  { %v1872_v53 = vand.u32 4294901760, %v1871_v14  ;;  %6755 = vst [vmem:[#allocation62_spill] sm:$0xff] %v5744_v8  ;;  %4739 = vmatprep.subr.mxu0 %v5733_v61  ;;  %v1712_v14 = vld [vmem:[%s6562_s4 + $0x10] sm:$0xff] }
 0x143   :  { %6757 = vst [vmem:[#allocation64_spill] sm:$0xff] %v5751_v16  ;;  %4740 = vmatpush3.msra.mxu0 %v5733_v61 }
 0x144   :  { %4755 = vmatprep.subr.mxu1 %v1872_v53 }
 0x145   :  { %4756 = vmatpush3.msra.mxu1 %v1872_v53 }
 0x146   :  { %4757 = vmatprep.subr.mxu1 %v1879_v58 }
 0x147   :  { %4758 = vmatpush3.msra.mxu1 %v1879_v58 }
 0x1b2   :  { %v4587_v48 = vpop.f32.mrf.mxu0 }
 0x1b4   :  { %v5609_v55 = vpop.f32.mrf.mxu0 }
 0x1b7   :  { %v5611_v60 = vpop.f32.mrf.mxu0 }
 0x1b9   :  { %v5613_v5 = vpop.f32.mrf.mxu0 }
 0x1bc   :  { %v5615_v15 = vpop.f32.mrf.mxu0  ;;  %v4613_v19 = vpop.f32.mrf.mxu1 }
 0x1bd   :  { %v973_v62 = vadd.f32 %v4613_v19, %v4587_v48  ;;  %v1713_v48 = vld [vmem:[%s6562_s4 + $0x18] sm:$0xff] }
 0x1be   :  { %v5617_v23 = vpop.f32.mrf.mxu0  ;;  %v5619_v29 = vpop.f32.mrf.mxu1 }
 0x1bf   :  { %v967_v39 = vadd.f32 %v5619_v29, %v5609_v55  ;;  %v1885_v55 = vsub.f32 %v5728_v47, %v5744_v8  ;;  %v5763_v29 = vand.u32 4294901760, %v1712_v14 }
 0x1c0   :  { %v5621_v46 = vpop.f32.mrf.mxu0 }
 0x1c1   :  { %v5623_v49 = vpop.f32.mrf.mxu1  ;;  %6759 = vst [vmem:[#allocation66_spill] sm:$0xff] %v5763_v29  ;;  %v1886_v47 = vand.u32 4294901760, %v1885_v55 }
 0x1c2   :  { %v5625_v3 = vpop.f32.mrf.mxu0 }
 0x1c3   :  { %v5627_v4 = vpop.f32.mrf.mxu1  ;;  %4759 = vmatprep.subr.mxu1 %v1886_v47 }
 0x1c4   :  { %v5629_v63 = vpop.f32.mrf.mxu0  ;;  %4760 = vmatpush3.msra.mxu1 %v1886_v47 }
 0x1c5   :  { %v5631_v50 = vpop.f32.mrf.mxu1 }
 0x1c6   :  { %v5633_v35 = vpop.f32.mrf.mxu0 }
 0x1c7   :  { %v5635_v27 = vpop.f32.mrf.mxu1 }
 0x1c8   :  { %v5637_v7 = vpop.f32.mrf.mxu0  ;;  %v991_v47 = vadd.f32 %v5635_v27, %v5617_v23 }
 0x1c9   :  { %v5639_v42 = vpop.f32.mrf.mxu1 }
 0x1ca   :  { %v5641_v54 = vpop.f32.mrf.mxu0 }
 0x1cb   :  { %v5643_v28 = vpop.f32.mrf.mxu1 }
 0x1cc   :  { %v4639_v31 = vpop.f32.mrf.mxu0 }
 0x1cd   :  { %v5645_v12 = vpop.f32.mrf.mxu1  ;;  %v1120_v19 = vadd.f32 %v4639_v31, %v973_v62 }
 0x1ce   :  { %v5647_v20 = vpop.f32.mrf.mxu0 }
 0x1cf   :  { %v5649_v56 = vpop.f32.mrf.mxu1  ;;  %v1113_v22 = vadd.f32 %v5647_v20, %v967_v39  ;;  %v5780_v39 = vsub.f32 %v1712_v14, %v5763_v29  ;;  %v997_v20 = vadd.f32 %v5631_v50, %v5615_v15  ;;  %v1710_v14 = vld [vmem:[%s6562_s4] sm:$0xff] }
 0x1d0   :  { %v5651_v9 = vpop.f32.mrf.mxu0  ;;  %v5803_v15 = vand.u32 4294901760, %v1710_v14 }
 0x1d1   :  { %v5653_v36 = vpop.f32.mrf.mxu1  ;;  %v5798_v50 = vand.u32 4294901760, %v5780_v39 }
 0x1d2   :  { %v5655_v1 = vpop.f32.mrf.mxu0 }
 0x1d3   :  { %v5657_v24 = vpop.f32.mrf.mxu1  ;;  %6762 = vst [vmem:[#allocation69_spill] sm:$0xff] %v5798_v50 }
 0x1d4   :  { %v5659_v41 = vpop.f32.mrf.mxu0 }
 0x1d5   :  { %v4665_v10 = vpop.f32.mrf.mxu1 }
 0x1d6   :  { %v5661_v45 = vpop.f32.mrf.mxu0  ;;  %v1275_v31 = vadd.f32 %v4665_v10, %v1120_v19  ;;  %v1711_v19 = vld [vmem:[%s6562_s4 + $0x8] sm:$0xff] }
 0x1d7   :  { %v5663_v2 = vpop.f32.mrf.mxu1  ;;  %v5782_v53 = vand.u32 4294901760, %v1711_v19 }
 0x1d8   :  { %v5665_v17 = vpop.f32.mrf.mxu0 }
 0x1d9   :  { %v5667_v57 = vpop.f32.mrf.mxu1 }
 0x1da   :  { %v5669_v51 = vpop.f32.mrf.mxu0 }
 0x1db   :  { %v5671_v59 = vpop.f32.mrf.mxu1 }
 0x1dc   :  { %v5673_v37 = vpop.f32.mrf.mxu0 }
 0x1dd   :  { %v5675_v25 = vpop.f32.mrf.mxu1 }
 0x1de   :  { %v5677_v26 = vpop.f32.mrf.mxu0 }
 0x1df   :  { %v5679_v44 = vpop.f32.mrf.mxu1 }
 0x1e0   :  { %v5684_v13 = vpop.f32.mrf.mxu0 }
 0x1e1   :  { %v5688_v21 = vpop.f32.mrf.mxu1 }
 0x1e2   :  { %v5693_v18 = vpop.f32.mrf.mxu0 }
 0x1e3   :  { %6747 = vst [vmem:[#allocation54_spill] sm:$0xff] %v5693_v18  ;;  %v5701_v38 = vpop.f32.mrf.mxu1  ;;  %v5753_v18 = vand.u32 4294901760, %v1713_v48 }
 0x1e4   :  { %v4691_v30 = vpop.f32.mrf.mxu0 }
 0x1e5   :  { %v5716_v34 = vpop.f32.mrf.mxu1  ;;  %6758 = vst [vmem:[#allocation65_spill] sm:$0xff] %v5753_v18  ;;  %v5773_v10 = vsub.f32 %v1713_v48, %v5753_v18  ;;  %4741 = vmatprep.subr.mxu0 %v5753_v18  ;;  %v1444_v0 = vadd.f32 %v4691_v30, %v1275_v31  ;;  %v1267_v48 = vadd.f32 %v5663_v2, %v1113_v22 }
 0x1e6   :  { %v1437_v40 = vpop.f32.mrf.mxu0  ;;  %4742 = vmatpush3.msra.mxu0 %v5753_v18  ;;  %v5801_v2 = vsub.f32 %v1711_v19, %v5782_v53 }
 0x1e7   :  { %v5731_v43 = vpop.f32.mrf.mxu1  ;;  %v5791_v31 = vand.u32 4294901760, %v5773_v10  ;;  %4743 = vmatprep.subr.mxu0 %v5763_v29 }
 0x1e8   :  { %v5739_v33 = vpop.f32.mrf.mxu0  ;;  %6763 = vst [vmem:[#allocation70_spill] sm:$0xff] %v5801_v2  ;;  %4744 = vmatpush3.msra.mxu0 %v5763_v29  ;;  %v5816_v29 = vand.u32 4294901760, %v5801_v2 }
 0x1e9   :  { %v5748_v32 = vpop.f32.mrf.mxu1  ;;  %6761 = vst [vmem:[#allocation68_spill] sm:$0xff] %v5791_v31  ;;  %4745 = vmatprep.subr.mxu0 %v5782_v53 }
 0x1ea   :  { %6756 = vst [vmem:[#allocation63_spill] sm:$0xff] %v5748_v32  ;;  %v5759_v62 = vpop.f32.mrf.mxu0  ;;  %v5770_v32 = vand.u32 4294901760, %v5751_v16  ;;  %6764 = vst [vmem:[#allocation71_spill] sm:$0xff] %v5816_v29  ;;  %4746 = vmatpush3.msra.mxu0 %v5782_v53 }
 0x1eb   :  { %v5767_v11 = vpop.f32.mrf.mxu1  ;;  %4747 = vmatprep.subr.mxu0 %v5803_v15 }
 0x1ec   :  { %6760 = vst [vmem:[#allocation67_spill] sm:$0xff] %v5770_v32  ;;  %v4697_v8 = vpop.f32.mrf.mxu0  ;;  %v1892_v30 = vsub.f32 %v5751_v16, %v5770_v32  ;;  %v1899_v32 = vsub.f32 %v5773_v10, %v5791_v31  ;;  %v1906_v16 = vsub.f32 %v5780_v39, %v5798_v50  ;;  %v1913_v50 = vsub.f32 %v5801_v2, %v5816_v29 }
 0x1ed   :  { %v4717_v61 = vpop.f32.mrf.mxu1  ;;  %4748 = vmatpush3.msra.mxu0 %v5803_v15 }
 0x1ee   :  { %v1585_v55 = vadd.f32 %v4717_v61, %v1444_v0  ;;  %v1461_v18 = vpop.f32.mrf.mxu0  ;;  %v1893_v22 = vand.u32 4294901760, %v1892_v30  ;;  %v1148_v61 = vadd.f32 %v5659_v41, %v997_v20  ;;  %v1438_v0 = vadd.f32 %v1437_v40, %v1267_v48  ;;  %4777 = vmatprep.subr.mxu0 %v5696_v52 }
 0x1ef   :  { %v1578_v58 = vpop.f32.mrf.mxu1  ;;  %v1900_v41 = vand.u32 4294901760, %v1899_v32  ;;  %v5824_v40 = vsub.f32 %v1710_v14, %v5803_v15 }
 0x1f0   :  { %1654 = vrot.lane.b32.xlu0 %v1585_v55, %s5156_s20  ;;  %v5811_v19 = vpop.f32.mrf.mxu0  ;;  %4761 = vmatprep.subr.mxu1 %v1893_v22  ;;  %v1307_v20 = vadd.f32 %v5675_v25, %v1148_v61  ;;  %v1579_v48 = vadd.f32 %v1578_v58, %v1438_v0  ;;  %v1907_v55 = vand.u32 4294901760, %v1906_v16  ;;  %v1141_v25 = vadd.f32 %v5661_v45, %v991_v47 }
 0x1f1   :  { %v5821_v30 = vpop.f32.mrf.mxu1  ;;  %4762 = vmatpush3.msra.mxu1 %v1893_v22  ;;  %v5836_v32 = vand.u32 4294901760, %v5824_v40  ;;  %v1914_v16 = vand.u32 4294901760, %v1913_v50  ;;  %v1021_v61 = vadd.f32 %v5645_v12, %v5629_v63 }
 0x1f2   :  { %v5831_v27 = vpop.f32.mrf.mxu0  ;;  %4763 = vmatprep.subr.mxu1 %v1900_v41  ;;  %v1468_v14 = vadd.f32 %v4697_v8, %v1307_v20  ;;  %v1299_v0 = vadd.f32 %v5679_v44, %v1141_v25  ;;  %v1015_v8 = vadd.f32 %v5649_v56, %v5633_v35  ;;  %v985_v44 = vadd.f32 %v5623_v49, %v5611_v60 }
 0x1f3   :  { %v5833_v23 = vpop.f32.mrf.mxu1  ;;  %4764 = vmatpush3.msra.mxu1 %v1900_v41  ;;  %v1920_v22 = vsub.f32 %v5824_v40, %v5836_v32  ;;  %v1176_v50 = vadd.f32 %v5673_v37, %v1021_v61  ;;  %v979_v37 = vadd.f32 %v5627_v4, %v5613_v5  ;;  %v1003_v5 = vadd.f32 %v5643_v28, %v5625_v3 }
 0x1f4   :  { %1652 = vrot.lane.b32.xlu0 %v1579_v48, %s5156_s20  ;;  %4765 = vmatprep.subr.mxu1 %v1907_v55  ;;  %v4703_v31 = vpop.f32.mrf.mxu0  ;;  %v1462_v47 = vadd.f32 %v1461_v18, %v1299_v0  ;;  %v1169_v12 = vadd.f32 %v5677_v26, %v1015_v8  ;;  %v1134_v35 = vadd.f32 %v5651_v9, %v985_v44  ;;  %v6768_v44 = vld [vmem:[#allocation11_spill] sm:$0xff] }
 0x1f5   :  { %v4723_v58 = vpop.f32.mrf.mxu1  ;;  %4766 = vmatpush3.msra.mxu1 %v1907_v55  ;;  %v1921_v45 = vand.u32 4294901760, %v1920_v22  ;;  %v1339_v63 = vadd.f32 %v5716_v34, %v1176_v50  ;;  %v1009_v26 = vadd.f32 %v5639_v42, %v5621_v46  ;;  %v1127_v60 = vadd.f32 %v5655_v1, %v979_v37 }
 0x1f6   :  { %v1609_v29 = vadd.f32 %v4723_v58, %v1468_v14  ;;  %4767 = vmatprep.subr.mxu1 %v1914_v16  ;;  %v1485_v48 = vpop.f32.mrf.mxu0  ;;  %v1331_v18 = vadd.f32 %v5731_v43, %v1169_v12  ;;  %v1291_v49 = vadd.f32 %v5667_v57, %v1134_v35  ;;  %v1033_v1 = vadd.f32 %v5653_v36, %v5637_v7 }
 0x1f7   :  { %v1602_v2 = vpop.f32.mrf.mxu1  ;;  %4768 = vmatpush3.msra.mxu1 %v1914_v16  ;;  %v1162_v9 = vadd.f32 %v5665_v17, %v1009_v26  ;;  %v1283_v43 = vadd.f32 %v5671_v59, %v1127_v60  ;;  %v1155_v57 = vadd.f32 %v5669_v51, %v1003_v5  ;;  %v1027_v59 = vadd.f32 %v5657_v24, %v5641_v54 }
 0x1f8   :  { %1670 = vrot.lane.b32.xlu1 %v1609_v29, %s5157_s21  ;;  %4769 = vmatprep.subr.mxu1 %v1921_v45  ;;  %v1603_v20 = vadd.f32 %v1602_v2, %v1462_v47  ;;  %v1492_v29 = vadd.f32 %v4703_v31, %v1339_v63  ;;  %v1486_v2 = vadd.f32 %v1485_v48, %v1331_v18  ;;  %v4706_v17 = vpop.f32.mrf.mxu0 }
 0x1f9   :  { %v4726_v41 = vpop.f32.mrf.mxu1  ;;  %4770 = vmatpush3.msra.mxu1 %v1921_v45  ;;  %v1456_v31 = vadd.f32 %v5739_v33, %v1291_v49  ;;  %v1323_v42 = vadd.f32 %v5688_v21, %v1162_v9  ;;  %v1450_v28 = vadd.f32 %v5759_v62, %v1283_v43  ;;  %v1190_v33 = vadd.f32 %v5684_v13, %v1033_v1  ;;  %v6765_v21 = vld [vmem:[#allocation54_spill] sm:$0xff]  ;;  %v6769_v9 = vld [vmem:[#allocation55_spill] sm:$0xff] }
 0x1fa   :  { %4799 = vmatprep.subr.mxu1 %v5686_v6  ;;  %v1315_v3 = vadd.f32 %v5701_v38, %v1155_v57  ;;  %v1183_v62 = vadd.f32 %v6765_v21, %v1027_v59  ;;  %v1497_v24 = vpop.f32.mrf.mxu0 }
 0x1fb   :  { %v1614_v56 = vpop.f32.mrf.mxu1  ;;  %v1597_v46 = vadd.f32 %v5821_v30, %v1456_v31  ;;  %v1480_v36 = vadd.f32 %v5811_v19, %v1323_v42  ;;  %v1591_v51 = vadd.f32 %v5833_v23, %v1450_v28  ;;  %v6766_v30 = vld [vmem:[#allocation63_spill] sm:$0xff]  ;;  %v6771_v42 = vld [vmem:[#allocation58_spill] sm:$0xff] }
 0x1fc   :  { %1668 = vrot.lane.b32.xlu1 %v1603_v20, %s5157_s21  ;;  %v1355_v14 = vadd.f32 %v6766_v30, %v1190_v33  ;;  %v1474_v16 = vadd.f32 %v5831_v27, %v1315_v3  ;;  %v1347_v54 = vadd.f32 %v5767_v11, %v1183_v62  ;;  %v6767_v11 = vld [vmem:[#allocation9_spill] sm:$0xff]  ;;  %v6770_v31 = vld [vmem:[#allocation15_spill] sm:$0xff] }
 0x1fd   :  { %v4729_v34 = vpop.f32.mrf.mxu1  ;;  %v1621_v58 = vadd.f32 %v4726_v41, %v1480_v36 }
 0x1fe   :  { %v1633_v55 = vadd.f32 %v4729_v34, %v1492_v29  ;;  %v1504_v38 = vadd.f32 %v4706_v17, %v1355_v14  ;;  %v1615_v13 = vadd.f32 %v1614_v56, %v1474_v16  ;;  %v1498_v23 = vadd.f32 %v1497_v24, %v1347_v54  ;;  %v6774_v16 = vld [vmem:[#allocation65_spill] sm:$0xff] }
 0x1ff   :  { %v1626_v4 = vpop.f32.mrf.mxu1  ;;  %v6775_v54 = vld [vmem:[#allocation57_spill] sm:$0xff] }
 0x200   :  { %v1627_v25 = vadd.f32 %v1626_v4, %v1486_v2  ;;  %1686 = vrot.lane.b32.xlu1 %v1633_v55, %s5158_s22 }
 0x201   :  { %v4732_v7 = vpop.f32.mrf.mxu1 }
 0x202   :  { %1684 = vrot.lane.b32.xlu0 %v1627_v25, %s5158_s22  ;;  %v1645_v22 = vadd.f32 %v4732_v7, %v1504_v38  ;;  %v6773_v7 = vld [vmem:[#allocation61_spill] sm:$0xff]  ;;  %v6776_v38 = vld [vmem:[#allocation66_spill] sm:$0xff] }
 0x203   :  { %v1638_v19 = vpop.f32.mrf.mxu1 }
 0x204   :  { %1658 = vrot.lane.b32.xlu1 %v1597_v46, %s5156_s20  ;;  %v1639_v61 = vadd.f32 %v1638_v19, %v1498_v23  ;;  %v6772_v46 = vld [vmem:[#allocation18_spill] sm:$0xff]  ;;  %v6777_v19 = vld [vmem:[#allocation60_spill] sm:$0xff] }
 0x206   :  { %1656 = vrot.lane.b32.xlu0 %v1591_v51, %s5156_s20 }
 0x208   :  { %1674 = vrot.lane.b32.xlu1 %v1621_v58, %s5157_s21 }
 0x20a   :  { %1672 = vrot.lane.b32.xlu0 %v1615_v13, %s5157_s21 }
 0x20c   :  { %1690 = vrot.lane.b32.xlu1 %v1645_v22, %s5158_s22  ;;  %v6778_v22 = vld [vmem:[#allocation64_spill] sm:$0xff] }
 0x20e   :  { %1688 = vrot.lane.b32.xlu0 %v1639_v61, %s5158_s22 }
 0x262   :  { %v1655_v27 = vpop.permute.xlu0 %1654 }
 0x263   :  { %v1698_v50 = vsel %vm1696_vm3, %v6767_v11, %v1655_v27  ;;  %v6784_v11 = vld [vmem:[#allocation68_spill] sm:$0xff] }
 0x266   :  { %v1653_v8 = vpop.permute.xlu0 %1652 }
 0x267   :  { %v1697_v12 = vsel %vm1696_vm3, %v6768_v44, %v1653_v8  ;;  %v6779_v8 = vld [vmem:[#allocation70_spill] sm:$0xff] }
 0x26a   :  { %v1671_v0 = vpop.permute.xlu1 %1670 }
 0x26b   :  { %v1702_v47 = vsel %vm653_vm2, %v1698_v50, %v1671_v0  ;;  %v6786_v50 = vld [vmem:[#allocation71_spill] sm:$0xff] }
 0x26e   :  { %v1669_v45 = vpop.permute.xlu1 %1668 }
 0x26f   :  { %v1701_v20 = vsel %vm653_vm2, %v1697_v12, %v1669_v45 }
 0x272   :  { %v1687_v41 = vpop.permute.xlu1 %1686 }
 0x273   :  { %v1707_v63 = vsel %vm1705_vm4, %v1702_v47, %v1687_v41  ;;  %v6787_v47 = vld [vmem:[#allocation2_spill] sm:$0xff] }
 0x274   :  { %v1730_v48 = vsel %vm1725_vm5, %v1707_v63, 0  ;;  %v1685_v56 = vpop.permute.xlu0 %1684 }
 0x275   :  { %v5901_v37 = vand.u32 4294901760, %v1730_v48  ;;  %v1706_v35 = vsel %vm1705_vm4, %v1701_v20, %v1685_v56 }
 0x276   :  { %v1727_v18 = vsel %vm1725_vm5, %v1706_v35, 0  ;;  %v1659_v29 = vpop.permute.xlu1 %1658 }
 0x277   :  { %v5906_v26 = vsub.f32 %v1730_v48, %v5901_v37  ;;  %v5908_v34 = vand.u32 4294901760, %v1727_v18  ;;  %v1700_v25 = vsel %vm1696_vm3, %v6770_v31, %v1659_v29 }
 0x278   :  { %v1657_v60 = vpop.permute.xlu0 %1656 }
 0x279   :  { %v1823_v49 = vand.u32 4294901760, %v5906_v26  ;;  %v5912_v2 = vsub.f32 %v1727_v18, %v5908_v34  ;;  %4771 = vmatprep.mubr.f32.mxu1 %v5908_v34  ;;  %v1699_v59 = vsel %vm1696_vm3, %v6772_v46, %v1657_v60 }
 0x27a   :  { %v1675_v55 = vpop.permute.xlu1 %1674  ;;  %4772 = vmatmul.mubr.f32.vlgmr.msra.gmra.mxu1 %v5901_v37 }
 0x27b   :  { %4800 = vmatpush3.msra.mxu1 %v5686_v6  ;;  %v1813_v5 = vand.u32 4294901760, %v5912_v2  ;;  %v1824_v4 = vsub.f32 %v5906_v26, %v1823_v49  ;;  %v1704_v57 = vsel %vm653_vm2, %v1700_v25, %v1675_v55 }
 0x27c   :  { %4801 = vmatprep.subr.mxu1 %v6769_v9  ;;  %v1673_v43 = vpop.permute.xlu0 %1672 }
 0x27d   :  { %4802 = vmatpush3.msra.mxu1 %v6769_v9  ;;  %v1814_v1 = vsub.f32 %v5912_v2, %v1813_v5  ;;  %v1825_v3 = vand.u32 4294901760, %v1824_v4  ;;  %v1703_v36 = vsel %vm653_vm2, %v1699_v59, %v1673_v43 }
 0x27e   :  { %4803 = vmatprep.subr.mxu1 %v6771_v42  ;;  %v1691_v28 = vpop.permute.xlu1 %1690 }
 0x27f   :  { %v1709_v17 = vsel %vm1705_vm4, %v1704_v57, %v1691_v28  ;;  %4804 = vmatpush3.msra.mxu1 %v6771_v42  ;;  %v1815_v33 = vand.u32 4294901760, %v1814_v1 }
 0x280   :  { %v1736_v51 = vsel %vm1725_vm5, %v1709_v17, 0  ;;  %4805 = vmatprep.subr.mxu1 %v6773_v7  ;;  %v1689_v21 = vpop.permute.xlu0 %1688 }
 0x281   :  { %v5933_v62 = vand.u32 4294901760, %v1736_v51  ;;  %4806 = vmatpush3.msra.mxu1 %v6773_v7  ;;  %v1708_v30 = vsel %vm1705_vm4, %v1703_v36, %v1689_v21  ;;  %4749 = vmatprep.mubr.f32.mxu0 %v1815_v33 }
 0x282   :  { %v1733_v14 = vsel %vm1725_vm5, %v1708_v30, 0  ;;  %4807 = vmatprep.subr.mxu1 %v6774_v16  ;;  %4750 = vmatmul.mubr.f32.vlgmr.msra.gmra.mxu0 %v1825_v3 }
 0x283   :  { %v5939_v58 = vand.u32 4294901760, %v1733_v14  ;;  %4778 = vmatpush3.msra.mxu0 %v5696_v52  ;;  %4808 = vmatpush3.msra.mxu1 %v6774_v16  ;;  %v1842_v24 = vsub.f32 %v1736_v51, %v5933_v62 }
 0x284   :  { %4779 = vmatprep.subr.mxu0 %v6775_v54  ;;  %4809 = vmatprep.subr.mxu1 %v6776_v38 }
 0x285   :  { %v1832_v13 = vsub.f32 %v1733_v14, %v5939_v58  ;;  %4780 = vmatpush3.msra.mxu0 %v6775_v54  ;;  %4810 = vmatpush3.msra.mxu1 %v6776_v38  ;;  %v1843_v23 = vand.u32 4294901760, %v1842_v24 }
 0x286   :  { %4774 = vmatprep.mubr.f32.mxu1 %v5939_v58  ;;  %4781 = vmatprep.subr.mxu0 %v6777_v19 }
 0x287   :  { %4811 = vmatprep.subr.mxu1 %v5782_v53  ;;  %4775 = vmatmul.mubr.f32.gmra.mxu1 %v5933_v62  ;;  %v1833_v52 = vand.u32 4294901760, %v1832_v13  ;;  %v1844_v0 = vsub.f32 %v1842_v24, %v1843_v23 }
 0x288   :  { %4782 = vmatpush3.msra.mxu0 %v6777_v19  ;;  %4812 = vmatpush3.msra.mxu1 %v5782_v53 }
 0x289   :  { %4783 = vmatprep.subr.mxu0 %v6778_v22  ;;  %4813 = vmatprep.subr.mxu1 %v5803_v15  ;;  %v1834_v61 = vsub.f32 %v1832_v13, %v1833_v52  ;;  %v1845_v45 = vand.u32 4294901760, %v1844_v0 }
 0x28a   :  { %4815 = vmatprep.mubr.f32.mxu1 %v1813_v5  ;;  %4784 = vmatpush3.msra.mxu0 %v6778_v22 }
 0x28b   :  { %4814 = vmatpush3.msra.mxu1 %v5803_v15  ;;  %4785 = vmatprep.subr.mxu0 %v5773_v10  ;;  %v1835_v27 = vand.u32 4294901760, %v1834_v61 }
 0x28c   :  { %4843 = vmatprep.subr.mxu1 %v5686_v6  ;;  %4786 = vmatpush3.msra.mxu0 %v5773_v10  ;;  %v6781_v10 = vld [vmem:[#allocation59_spill] sm:$0xff] }
 0x28d   :  { %4816 = vmatmul.mubr.f32.vlgmr.msra.gmra.mxu1 %v1823_v49  ;;  %4787 = vmatprep.subr.mxu0 %v5780_v39 }
 0x28e   :  { %4844 = vmatpush3.msra.mxu1 %v5686_v6  ;;  %4818 = vmatprep.mubr.f32.mxu1 %v1833_v52  ;;  %v6780_v6 = vld [vmem:[#allocation56_spill] sm:$0xff] }
 0x28f   :  { %4845 = vmatprep.subr.mxu1 %v6769_v9  ;;  %4788 = vmatpush3.msra.mxu0 %v5780_v39  ;;  %v6782_v39 = vld [vmem:[#allocation62_spill] sm:$0xff] }
 0x290   :  { %4846 = vmatpush3.msra.mxu1 %v6769_v9  ;;  %4752 = vmatprep.mubr.f32.mxu0 %v1835_v27 }
 0x291   :  { %4789 = vmatprep.subr.mxu0 %v6779_v8  ;;  %4847 = vmatprep.subr.mxu1 %v6771_v42 }
 0x292   :  { %4753 = vmatmul.mubr.f32.gmra.mxu0 %v1845_v45  ;;  %4819 = vmatmul.mubr.f32.gmra.mxu1 %v1843_v23 }
 0x293   :  { %4790 = vmatpush3.msra.mxu0 %v6779_v8  ;;  %4848 = vmatpush3.msra.mxu1 %v6771_v42 }
 0x294   :  { %4791 = vmatprep.subr.mxu0 %v5824_v40  ;;  %4793 = vmatprep.mubr.f32.mxu0 %v5912_v2 }
 0x295   :  { %4849 = vmatprep.subr.mxu1 %v6773_v7  ;;  %4859 = vmatprep.mubr.f32.mxu1 %v5908_v34 }
 0x296   :  { %4792 = vmatpush3.msra.mxu0 %v5824_v40  ;;  %4850 = vmatpush3.msra.mxu1 %v6773_v7  ;;  %v6783_v40 = vld [vmem:[#allocation67_spill] sm:$0xff] }
 0x297   :  { %4821 = vmatprep.subr.mxu0 %v6780_v6  ;;  %4851 = vmatprep.subr.mxu1 %v6774_v16 }
 0x298   :  { %4794 = vmatmul.mubr.f32.vlgmr.msra.gmra.mxu0 %v5906_v26  ;;  %4852 = vmatpush3.msra.mxu1 %v6774_v16 }
 0x299   :  { %4822 = vmatpush3.msra.mxu0 %v6780_v6  ;;  %4796 = vmatprep.mubr.f32.mxu0 %v1832_v13 }
 0x29a   :  { %4823 = vmatprep.subr.mxu0 %v6781_v10  ;;  %4853 = vmatprep.subr.mxu1 %v6776_v38 }
 0x29b   :  { %4824 = vmatpush3.msra.mxu0 %v6781_v10  ;;  %4854 = vmatpush3.msra.mxu1 %v6776_v38 }
 0x29c   :  { %4825 = vmatprep.subr.mxu0 %v6782_v39  ;;  %4855 = vmatprep.subr.mxu1 %v5782_v53 }
 0x29d   :  { %4797 = vmatmul.mubr.f32.gmra.mxu0 %v1842_v24  ;;  %4856 = vmatpush3.msra.mxu1 %v5782_v53  ;;  %v6785_v53 = vld [vmem:[#allocation69_spill] sm:$0xff] }
 0x29e   :  { %4826 = vmatpush3.msra.mxu0 %v6782_v39  ;;  %4837 = vmatprep.mubr.f32.mxu0 %v5908_v34 }
 0x29f   :  { %4827 = vmatprep.subr.mxu0 %v6783_v40  ;;  %4857 = vmatprep.subr.mxu1 %v5803_v15 }
 0x2a0   :  { %4828 = vmatpush3.msra.mxu0 %v6783_v40  ;;  %4858 = vmatpush3.msra.mxu1 %v5803_v15  ;;  %v6788_v15 = vld [vmem:[#allocation5_spill] sm:$0xff] }
 0x2a1   :  { %4829 = vmatprep.subr.mxu0 %v6784_v11  ;;  %4860 = vmatmul.mubr.f32.vlgmr.msra.gmra.mxu1 %v5901_v37 }
 0x2a2   :  { %4830 = vmatpush3.msra.mxu0 %v6784_v11  ;;  %4862 = vmatprep.mubr.f32.mxu1 %v5939_v58 }
 0x2a3   :  { %4831 = vmatprep.subr.mxu0 %v6785_v53 }
 0x2a4   :  { %4832 = vmatpush3.msra.mxu0 %v6785_v53 }
 0x2a5   :  { %4833 = vmatprep.subr.mxu0 %v6786_v50  ;;  %4863 = vmatmul.mubr.f32.gmra.mxu1 %v5933_v62 }
 0x2a6   :  { %4834 = vmatpush3.msra.mxu0 %v6786_v50  ;;  %4899 = vmatprep.mubr.f32.mxu1 %v6787_v47 }
 0x2a7   :  { %4835 = vmatprep.subr.mxu0 %v5836_v32 }
 0x2a8   :  { %4836 = vmatpush3.msra.mxu0 %v5836_v32  ;;  %v4134_v32 = vld [vmem:[%s6563_s5] ss:$0 sm:$0xff] }
 0x2a9   :  { %4838 = vmatmul.mubr.f32.vlgmr.msra.gmra.mxu0 %v5901_v37 }
 0x2aa   :  { %4840 = vmatprep.mubr.f32.mxu0 %v5939_v58 }
 0x2ad   :  { %4841 = vmatmul.mubr.f32.gmra.mxu0 %v5933_v62 }
 0x2ae   :  { %4873 = vmatprep.mubr.f32.mxu0 %v6788_v15 }
 0x33a   :  { %v4773_v41 = vpop.f32.mrf.mxu1 }
 0x33c   :  { %v1958_v44 = vpop.f32.mrf.mxu1 }
 0x342   :  { %v4751_v12 = vpop.f32.mrf.mxu0 }
 0x343   :  { %v1828_v26 = vadd.f32 %v4751_v12, %v4134_v32 }
 0x344   :  { %v1817_v20 = vpop.f32.mrf.mxu0 }
 0x345   :  { %v1818_v49 = vadd.f32 %v4134_v32, %v1817_v20  ;;  %v1965_v55 = vadd.f32 %v4773_v41, %v1828_v26 }
 0x347   :  { %v4776_v63 = vpop.f32.mrf.mxu1  ;;  %v1959_v31 = vadd.f32 %v1958_v44, %v1818_v49  ;;  %v6798_v49 = vld [vmem:[#allocation6_spill] sm:$0xff] }
 0x349   :  { %v1970_v48 = vpop.f32.mrf.mxu1 }
 0x34d   :  { %v4817_v35 = vpop.f32.mrf.mxu1 }
 0x34f   :  { %v2166_v37 = vpop.f32.mrf.mxu1 }
 0x352   :  { %v4754_v56 = vpop.f32.mrf.mxu0  ;;  %v4820_v34 = vpop.f32.mrf.mxu1 }
 0x353   :  { %v1848_v2 = vadd.f32 %v4754_v56, %v4134_v32  ;;  %v6793_v56 = vld [vmem:[#allocation24_spill] sm:$0xff] }
 0x354   :  { %v1837_v18 = vpop.f32.mrf.mxu0  ;;  %v2182_v5 = vpop.f32.mrf.mxu1 }
 0x355   :  { %v1838_v9 = vadd.f32 %v4134_v32, %v1837_v18  ;;  %v1977_v57 = vadd.f32 %v4776_v63, %v1848_v2  ;;  %v6794_v32 = vld [vmem:[#allocation32_spill] sm:$0xff]  ;;  %v6799_v2 = vld [vmem:[#allocation46_spill] sm:$0xff] }
 0x357   :  { %v1971_v46 = vadd.f32 %v1970_v48, %v1838_v9  ;;  %v6803_v9 = vld [vmem:[#allocation50_spill] sm:$0xff] }
 0x358   :  { %v4795_v29 = vpop.f32.mrf.mxu0 }
 0x359   :  { %v2072_v43 = vadd.f32 %v4795_v29, %v1965_v55  ;;  %v6795_v29 = vld [vmem:[#allocation36_spill] sm:$0xff] }
 0x35a   :  { %v2064_v60 = vpop.f32.mrf.mxu0  ;;  %v6800_v55 = vld [vmem:[#allocation8_spill] sm:$0xff] }
 0x35b   :  { %v2065_v1 = vadd.f32 %v2064_v60, %v1959_v31  ;;  %v2175_v59 = vadd.f32 %v4817_v35, %v2072_v43  ;;  %v6797_v60 = vld [vmem:[#allocation43_spill] sm:$0xff]  ;;  %v6804_v43 = vld [vmem:[#allocation14_spill] sm:$0xff] }
 0x35c   :  { %v6805_v31 = vld [vmem:[#allocation51_spill] sm:$0xff] }
 0x35d   :  { %v4798_v4 = vpop.f32.mrf.mxu0  ;;  %v2167_v51 = vadd.f32 %v2166_v37, %v2065_v1  ;;  %v6807_v1 = vld [vmem:[#allocation52_spill] sm:$0xff] }
 0x35e   :  { %v2086_v28 = vadd.f32 %v4798_v4, %v1977_v57  ;;  %v6802_v4 = vld [vmem:[#allocation10_spill] sm:$0xff]  ;;  %v6808_v57 = vld [vmem:[#allocation21_spill] sm:$0xff] }
 0x35f   :  { %v2078_v42 = vpop.f32.mrf.mxu0 }
 0x360   :  { %v2079_v3 = vadd.f32 %v2078_v42, %v1971_v46  ;;  %v2191_v30 = vadd.f32 %v4820_v34, %v2086_v28  ;;  %v6796_v34 = vld [vmem:[#allocation40_spill] sm:$0xff]  ;;  %v6809_v42 = vld [vmem:[#allocation53_spill] sm:$0xff]  ;;  %v6811_v46 = vld [vmem:[#allocation3_spill] sm:$0xff] }
 0x361   :  { %v4861_v25 = vpop.f32.mrf.mxu1  ;;  %v6810_v28 = vld [vmem:[#allocation25_spill] sm:$0xff] }
 0x362   :  { %v2183_v38 = vadd.f32 %v2182_v5, %v2079_v3  ;;  %v6801_v5 = vld [vmem:[#allocation48_spill] sm:$0xff]  ;;  %v6815_v3 = vld [vmem:[#allocation35_spill] sm:$0xff] }
 0x363   :  { %v2382_v17 = vpop.f32.mrf.mxu1 }
 0x365   :  { %v4864_v14 = vpop.f32.mrf.mxu1 }
 0x367   :  { %v2394_v22 = vpop.f32.mrf.mxu1 }
 0x369   :  { %v4839_v33 = vpop.f32.mrf.mxu0 }
 0x36a   :  { %v2292_v36 = vadd.f32 %v4839_v33, %v2175_v59  ;;  %v6812_v59 = vld [vmem:[#allocation28_spill] sm:$0xff]  ;;  %v6814_v33 = vld [vmem:[#allocation31_spill] sm:$0xff] }
 0x36b   :  { %v2285_v7 = vpop.f32.mrf.mxu0 }
 0x36c   :  { %v2389_v21 = vadd.f32 %v4861_v25, %v2292_v36  ;;  %v2286_v62 = vadd.f32 %v2285_v7, %v2167_v51  ;;  %v6806_v25 = vld [vmem:[#allocation17_spill] sm:$0xff]  ;;  %v6817_v51 = vld [vmem:[#allocation16_spill] sm:$0xff]  ;;  %v6818_v7 = vld [vmem:[#allocation39_spill] sm:$0xff] }
 0x36d   :  { %v4842_v16 = vpop.f32.mrf.mxu0  ;;  %v6816_v36 = vld [vmem:[#allocation13_spill] sm:$0xff] }
 0x36e   :  { %v6014_v58 = vmax.f32 %v2389_v21, 0.0  ;;  %v2383_v24 = vadd.f32 %v2382_v17, %v2286_v62  ;;  %v2304_v54 = vadd.f32 %v4842_v16, %v2191_v30  ;;  %v6813_v17 = vld [vmem:[#allocation7_spill] sm:$0xff]  ;;  %v6819_v21 = vld [vmem:[#allocation20_spill] sm:$0xff] }
 0x36f   :  { %v2297_v13 = vpop.f32.mrf.mxu0  ;;  %v6820_v62 = vld [vmem:[#allocation4_spill] sm:$0xff]  ;;  %v6821_v30 = vld [vmem:[#allocation23_spill] sm:$0xff] }
 0x370   :  { %6789 = vst [vmem:[#allocation54_spill] sm:$0xff] %v6014_v58  ;;  %v6016_v19 = vmax.f32 %v2383_v24, 0.0  ;;  %v2401_v52 = vadd.f32 %v4864_v14, %v2304_v54  ;;  %v2298_v23 = vadd.f32 %v2297_v13, %v2183_v38  ;;  %v6019_v61 = vand.u32 4294901760, %v6014_v58  ;;  %v6822_v14 = vld [vmem:[#allocation12_spill] sm:$0xff]  ;;  %v6823_v16 = vld [vmem:[#allocation27_spill] sm:$0xff]  ;;  %v6825_v54 = vld [vmem:[#allocation30_spill] sm:$0xff] }
 0x371   :  { %v6824_v24 = vld [vmem:[#allocation19_spill] sm:$0xff]  ;;  %v6826_v38 = vld [vmem:[#allocation22_spill] sm:$0xff] }
 0x372   :  { %6790 = vst [vmem:[#allocation63_spill] sm:$0xff] %v6016_v19  ;;  %v6021_v27 = vmax.f32 %v2401_v52, 0.0  ;;  %v2395_v0 = vadd.f32 %v2394_v22, %v2298_v23  ;;  %v6024_v45 = vand.u32 4294901760, %v6016_v19  ;;  %v2637_v10 = vsub.f32 %v6014_v58, %v6019_v61  ;;  %v6827_v13 = vld [vmem:[#allocation34_spill] sm:$0xff]  ;;  %v6830_v22 = vld [vmem:[#allocation29_spill] sm:$0xff] }
 0x373   :  { %v6828_v52 = vld [vmem:[#allocation26_spill] sm:$0xff] }
 0x374   :  { %6791 = vst [vmem:[#allocation9_spill] sm:$0xff] %v6021_v27  ;;  %v6027_v8 = vand.u32 4294901760, %v6021_v27  ;;  %v6029_v6 = vmax.f32 %v2395_v0, 0.0  ;;  %v2644_v11 = vsub.f32 %v6016_v19, %v6024_v45  ;;  %v6048_v15 = vand.u32 4294901760, %v2637_v10  ;;  %v6829_v23 = vld [vmem:[#allocation38_spill] sm:$0xff] }
 0x375   :  { %v6831_v0 = vld [vmem:[#allocation42_spill] sm:$0xff] }
 0x376   :  { %6792 = vst [vmem:[#allocation11_spill] sm:$0xff] %v6029_v6  ;;  %v2623_v39 = vsub.f32 %v6021_v27, %v6027_v8  ;;  %v6036_v40 = vand.u32 4294901760, %v6029_v6  ;;  %4865 = vmatprep.subr.mxu0 %v6027_v8  ;;  %v6053_v12 = vand.u32 4294901760, %v2644_v11  ;;  %v2639_v48 = vsub.f32 %v2637_v10, %v6048_v15 }
 0x377   :  { %4866 = vmatpush3.msra.mxu0 %v6027_v8 }
 0x378   :  { %v2630_v53 = vsub.f32 %v6029_v6, %v6036_v40  ;;  %4867 = vmatprep.subr.mxu0 %v6036_v40  ;;  %v6045_v50 = vand.u32 4294901760, %v2623_v39  ;;  %v2646_v18 = vsub.f32 %v2644_v11, %v6053_v12  ;;  %v2640_v37 = vand.u32 4294901760, %v2639_v48 }
 0x379   :  { %4868 = vmatpush3.msra.mxu0 %v6036_v40 }
 0x37a   :  { %4869 = vmatprep.subr.mxu0 %v6019_v61  ;;  %v2625_v41 = vsub.f32 %v2623_v39, %v6045_v50  ;;  %v2631_v44 = vand.u32 4294901760, %v2630_v53  ;;  %v2647_v26 = vand.u32 4294901760, %v2646_v18 }
 0x37b   :  { %4870 = vmatpush3.msra.mxu0 %v6019_v61 }
 0x37c   :  { %4871 = vmatprep.subr.mxu0 %v6024_v45  ;;  %v2626_v63 = vand.u32 4294901760, %v2625_v41  ;;  %v2632_v20 = vsub.f32 %v2630_v53, %v2631_v44 }
 0x37d   :  { %4872 = vmatpush3.msra.mxu0 %v6024_v45 }
 0x37e   :  { %4874 = vmatmul.mubr.f32.vlgmr.msra.gmra.mxu0 %v6793_v56  ;;  %4891 = vmatprep.subr.mxu1 %v2626_v63  ;;  %v2633_v35 = vand.u32 4294901760, %v2632_v20 }
 0x37f   :  { %4917 = vmatprep.subr.mxu0 %v2623_v39  ;;  %4892 = vmatpush3.msra.mxu1 %v2626_v63 }
 0x380   :  { %4918 = vmatpush3.msra.mxu0 %v2623_v39  ;;  %4893 = vmatprep.subr.mxu1 %v2633_v35  ;;  %v6834_v39 = vld [vmem:[#allocation37_spill] sm:$0xff] }
 0x381   :  { %4919 = vmatprep.subr.mxu0 %v2630_v53  ;;  %4876 = vmatprep.mubr.f32.mxu0 %v6794_v32 }
 0x382   :  { %4894 = vmatpush3.msra.mxu1 %v2633_v35  ;;  %4920 = vmatpush3.msra.mxu0 %v2630_v53 }
 0x383   :  { %4877 = vmatmul.mubr.f32.gmra.mxu0 %v6795_v29  ;;  %4895 = vmatprep.subr.mxu1 %v2640_v37 }
 0x384   :  { %4921 = vmatprep.subr.mxu0 %v2637_v10  ;;  %4896 = vmatpush3.msra.mxu1 %v2640_v37 }
 0x385   :  { %4922 = vmatpush3.msra.mxu0 %v2637_v10  ;;  %4897 = vmatprep.subr.mxu1 %v2647_v26  ;;  %v6833_v10 = vld [vmem:[#allocation45_spill] sm:$0xff] }
 0x386   :  { %4923 = vmatprep.subr.mxu0 %v2644_v11  ;;  %4879 = vmatprep.mubr.f32.mxu0 %v6796_v34 }
 0x387   :  { %4898 = vmatpush3.msra.mxu1 %v2647_v26  ;;  %4924 = vmatpush3.msra.mxu0 %v2644_v11  ;;  %v6838_v11 = vld [vmem:[#allocation49_spill] sm:$0xff] }
 0x388   :  { %4880 = vmatmul.mubr.f32.gmra.mxu0 %v6797_v60  ;;  %4900 = vmatmul.mubr.f32.vlgmr.msra.gmra.mxu1 %v6798_v49 }
 0x389   :  { %4943 = vmatprep.subr.mxu1 %v6027_v8  ;;  %4969 = vmatprep.subr.mxu0 %v6045_v50 }
 0x38a   :  { %4944 = vmatpush3.msra.mxu1 %v6027_v8  ;;  %4882 = vmatprep.mubr.f32.mxu0 %v6799_v2 }
 0x38b   :  { %4945 = vmatprep.subr.mxu1 %v6036_v40  ;;  %4902 = vmatprep.mubr.f32.mxu1 %v6800_v55 }
 0x38c   :  { %4946 = vmatpush3.msra.mxu1 %v6036_v40  ;;  %4883 = vmatmul.mubr.f32.gmra.mxu0 %v6801_v5 }
 0x38d   :  { %4903 = vmatmul.mubr.f32.gmra.mxu1 %v6802_v4  ;;  %4947 = vmatprep.subr.mxu1 %v6019_v61 }
 0x38e   :  { %4948 = vmatpush3.msra.mxu1 %v6019_v61  ;;  %4885 = vmatprep.mubr.f32.mxu0 %v6803_v9 }
 0x38f   :  { %4949 = vmatprep.subr.mxu1 %v6024_v45  ;;  %4905 = vmatprep.mubr.f32.mxu1 %v6804_v43 }
 0x390   :  { %4950 = vmatpush3.msra.mxu1 %v6024_v45  ;;  %4886 = vmatmul.mubr.f32.gmra.mxu0 %v6805_v31 }
 0x391   :  { %4906 = vmatmul.mubr.f32.gmra.mxu1 %v6806_v25  ;;  %4995 = vmatprep.subr.mxu1 %v6027_v8 }
 0x392   :  { %4888 = vmatprep.mubr.f32.mxu0 %v6807_v1  ;;  %4908 = vmatprep.mubr.f32.mxu1 %v6808_v57 }
 0x394   :  { %4889 = vmatmul.mubr.f32.gmra.mxu0 %v6809_v42 }
 0x395   :  { %4909 = vmatmul.mubr.f32.gmra.mxu1 %v6810_v28  ;;  %4925 = vmatprep.mubr.f32.mxu0 %v6811_v46 }
 0x396   :  { %4911 = vmatprep.mubr.f32.mxu1 %v6812_v59 }
 0x398   :  { %4926 = vmatmul.mubr.f32.vlgmr.msra.gmra.mxu0 %v6813_v17 }
 0x399   :  { %4912 = vmatmul.mubr.f32.gmra.mxu1 %v6814_v33  ;;  %4970 = vmatpush3.msra.mxu0 %v6045_v50 }
 0x39a   :  { %4971 = vmatprep.subr.mxu0 %v2631_v44  ;;  %4914 = vmatprep.mubr.f32.mxu1 %v6815_v3 }
 0x39b   :  { %4972 = vmatpush3.msra.mxu0 %v2631_v44  ;;  %4928 = vmatprep.mubr.f32.mxu0 %v6816_v36 }
 0x39c   :  { %4973 = vmatprep.subr.mxu0 %v6048_v15  ;;  %4929 = vmatmul.mubr.f32.gmra.mxu0 %v6817_v51 }
 0x39d   :  { %4915 = vmatmul.mubr.f32.gmra.mxu1 %v6818_v7  ;;  %4974 = vmatpush3.msra.mxu0 %v6048_v15 }
 0x39e   :  { %4975 = vmatprep.subr.mxu0 %v6053_v12  ;;  %4931 = vmatprep.mubr.f32.mxu0 %v6819_v21  ;;  %v4142_v21 = vld [vmem:[%s6562_s4 + $0x78] sm:$0xff] }
 0x39f   :  { %4976 = vmatpush3.msra.mxu0 %v6053_v12  ;;  %4951 = vmatprep.mubr.f32.mxu1 %v6820_v62 }
 0x3a0   :  { %4932 = vmatmul.mubr.f32.gmra.mxu0 %v6821_v30  ;;  %v6222_v30 = vand.u32 4294901760, %v4142_v21 }
 0x3a1   :  { %4952 = vmatmul.mubr.f32.vlgmr.msra.gmra.mxu1 %v6822_v14  ;;  %4934 = vmatprep.mubr.f32.mxu0 %v6823_v16  ;;  %v4141_v16 = vld [vmem:[%s6562_s4 + $0x70] sm:$0xff] }
 0x3a2   :  { %4996 = vmatpush3.msra.mxu1 %v6027_v8  ;;  %4954 = vmatprep.mubr.f32.mxu1 %v6824_v24  ;;  %v6832_v8 = vld [vmem:[#allocation33_spill] sm:$0xff] }
 0x3a3   :  { %4997 = vmatprep.subr.mxu1 %v6036_v40  ;;  %5021 = vmatprep.subr.mxu0 %v6222_v30 }
 0x3a4   :  { %4998 = vmatpush3.msra.mxu1 %v6036_v40  ;;  %4935 = vmatmul.mubr.f32.gmra.mxu0 %v6825_v54  ;;  %v6836_v40 = vld [vmem:[#allocation44_spill] sm:$0xff]  ;;  %v6232_v54 = vsub.f32 %v4142_v21, %v6222_v30 }
 0x3a5   :  { %4999 = vmatprep.subr.mxu1 %v6019_v61  ;;  %4955 = vmatmul.mubr.f32.gmra.mxu1 %v6826_v38  ;;  %v6235_v38 = vand.u32 4294901760, %v4141_v16 }
 0x3a6   :  { %5000 = vmatpush3.msra.mxu1 %v6019_v61  ;;  %4937 = vmatprep.mubr.f32.mxu0 %v6827_v13  ;;  %v6835_v61 = vld [vmem:[#allocation41_spill] sm:$0xff] }
 0x3a7   :  { %5001 = vmatprep.subr.mxu1 %v6024_v45  ;;  %4957 = vmatprep.mubr.f32.mxu1 %v6828_v52  ;;  %6839 = vst [vmem:[#allocation55_spill] sm:$0xff] %v6235_v38  ;;  %v4140_v52 = vld [vmem:[%s6562_s4 + $0x68] sm:$0xff] }
 0x3a8   :  { %5002 = vmatpush3.msra.mxu1 %v6024_v45  ;;  %4938 = vmatmul.mubr.f32.gmra.mxu0 %v6829_v23  ;;  %v6837_v45 = vld [vmem:[#allocation47_spill] sm:$0xff] }
 0x3a9   :  { %4958 = vmatmul.mubr.f32.gmra.mxu1 %v6830_v22  ;;  %4940 = vmatprep.mubr.f32.mxu0 %v6831_v0  ;;  %v6244_v22 = vand.u32 4294901760, %v6232_v54  ;;  %v6247_v0 = vsub.f32 %v4141_v16, %v6235_v38 }
 0x3aa   :  { %4960 = vmatprep.mubr.f32.mxu1 %v6832_v8  ;;  %v6250_v8 = vand.u32 4294901760, %v4140_v52 }
 0x3ab   :  { %6840 = vst [vmem:[#allocation15_spill] sm:$0xff] %v6244_v22  ;;  %6841 = vst [vmem:[#allocation58_spill] sm:$0xff] %v6247_v0 }
 0x3ac   :  { %4941 = vmatmul.mubr.f32.gmra.mxu0 %v6833_v10  ;;  %6842 = vst [vmem:[#allocation18_spill] sm:$0xff] %v6250_v8  ;;  %v6264_v21 = vsub.f32 %v4140_v52, %v6250_v8 }
 0x3ad   :  { %4961 = vmatmul.mubr.f32.gmra.mxu1 %v6834_v39  ;;  %4977 = vmatprep.mubr.f32.mxu0 %v6787_v47  ;;  %v4139_v39 = vld [vmem:[%s6562_s4 + $0x60] sm:$0xff] }
 0x3ae   :  { %4963 = vmatprep.mubr.f32.mxu1 %v6835_v61  ;;  %6844 = vst [vmem:[#allocation65_spill] sm:$0xff] %v6264_v21  ;;  %v6270_v27 = vand.u32 4294901760, %v4139_v39  ;;  %v6281_v19 = vand.u32 4294901760, %v6264_v21 }
 0x3b0   :  { %4978 = vmatmul.mubr.f32.vlgmr.msra.gmra.mxu0 %v6798_v49  ;;  %6845 = vst [vmem:[#allocation57_spill] sm:$0xff] %v6270_v27  ;;  %6846 = vst [vmem:[#allocation66_spill] sm:$0xff] %v6281_v19  ;;  %v6286_v58 = vsub.f32 %v4139_v39, %v6270_v27 }
 0x3b1   :  { %4964 = vmatmul.mubr.f32.gmra.mxu1 %v6836_v40  ;;  %4980 = vmatprep.mubr.f32.mxu0 %v6800_v55 }
 0x3b2   :  { %4966 = vmatprep.mubr.f32.mxu1 %v6837_v45  ;;  %5022 = vmatpush3.msra.mxu0 %v6222_v30  ;;  %v3588_v45 = vsub.f32 %v6232_v54, %v6244_v22  ;;  %6848 = vst [vmem:[#allocation64_spill] sm:$0xff] %v6286_v58 }
 0x3b3   :  { %5023 = vmatprep.subr.mxu0 %v6235_v38 }
 0x3b4   :  { %4981 = vmatmul.mubr.f32.gmra.mxu0 %v6802_v4 }
 0x3b5   :  { %4967 = vmatmul.mubr.f32.gmra.mxu1 %v6838_v11  ;;  %4983 = vmatprep.mubr.f32.mxu0 %v6804_v43  ;;  %v6261_v11 = vand.u32 4294901760, %v6247_v0 }
 0x3b6   :  { %5003 = vmatprep.mubr.f32.mxu1 %v6787_v47  ;;  %5024 = vmatpush3.msra.mxu0 %v6235_v38  ;;  %v3589_v38 = vand.u32 4294901760, %v3588_v45 }
 0x3b7   :  { %6843 = vst [vmem:[#allocation61_spill] sm:$0xff] %v6261_v11  ;;  %5025 = vmatprep.subr.mxu0 %v6250_v8  ;;  %v3595_v52 = vsub.f32 %v6247_v0, %v6261_v11 }
 0x3b8   :  { %4984 = vmatmul.mubr.f32.gmra.mxu0 %v6806_v25  ;;  %5043 = vmatprep.subr.mxu1 %v3589_v38 }
 0x3b9   :  { %5004 = vmatmul.mubr.f32.vlgmr.msra.gmra.mxu1 %v6798_v49  ;;  %4986 = vmatprep.mubr.f32.mxu0 %v6808_v57  ;;  %v3596_v11 = vand.u32 4294901760, %v3595_v52 }
 0x3ba   :  { %5006 = vmatprep.mubr.f32.mxu1 %v6800_v55  ;;  %5026 = vmatpush3.msra.mxu0 %v6250_v8 }
 0x3bb   :  { %5027 = vmatprep.subr.mxu0 %v6270_v27  ;;  %5044 = vmatpush3.msra.mxu1 %v3589_v38 }
 0x3bc   :  { %4987 = vmatmul.mubr.f32.gmra.mxu0 %v6810_v28  ;;  %5045 = vmatprep.subr.mxu1 %v3596_v11 }
 0x3bd   :  { %5007 = vmatmul.mubr.f32.gmra.mxu1 %v6802_v4  ;;  %4989 = vmatprep.mubr.f32.mxu0 %v6812_v59 }
 0x3be   :  { %5009 = vmatprep.mubr.f32.mxu1 %v6804_v43  ;;  %5028 = vmatpush3.msra.mxu0 %v6270_v27 }
 0x3bf   :  { %5046 = vmatpush3.msra.mxu1 %v3596_v11 }
 0x3c0   :  { %4990 = vmatmul.mubr.f32.gmra.mxu0 %v6814_v33 }
 0x3c1   :  { %5010 = vmatmul.mubr.f32.gmra.mxu1 %v6806_v25  ;;  %4992 = vmatprep.mubr.f32.mxu0 %v6815_v3 }
 0x3c2   :  { %5012 = vmatprep.mubr.f32.mxu1 %v6808_v57 }
 0x3c4   :  { %4993 = vmatmul.mubr.f32.gmra.mxu0 %v6818_v7 }
 0x3c5   :  { %5013 = vmatmul.mubr.f32.gmra.mxu1 %v6810_v28 }
 0x3c6   :  { %5015 = vmatprep.mubr.f32.mxu1 %v6812_v59 }
 0x3c9   :  { %5016 = vmatmul.mubr.f32.gmra.mxu1 %v6814_v33 }
 0x3ca   :  { %5018 = vmatprep.mubr.f32.mxu1 %v6815_v3 }
 0x3cd   :  { %5019 = vmatmul.mubr.f32.gmra.mxu1 %v6818_v7 }
 0x43e   :  { %v4875_v47 = vpop.f32.mrf.mxu0 }
 0x440   :  { %v6151_v53 = vpop.f32.mrf.mxu0 }
 0x443   :  { %v6153_v50 = vpop.f32.mrf.mxu0 }
 0x445   :  { %v6155_v15 = vpop.f32.mrf.mxu0 }
 0x448   :  { %v6157_v41 = vpop.f32.mrf.mxu0  ;;  %v4901_v44 = vpop.f32.mrf.mxu1 }
 0x449   :  { %v2691_v61 = vadd.f32 %v4901_v44, %v4875_v47  ;;  %v4138_v47 = vld [vmem:[%s6562_s4 + $0x58] sm:$0xff] }
 0x44a   :  { %v6159_v12 = vpop.f32.mrf.mxu0  ;;  %v2684_v63 = vpop.f32.mrf.mxu1  ;;  %v6288_v8 = vand.u32 4294901760, %v4138_v47 }
 0x44b   :  { %v2685_v16 = vadd.f32 %v2684_v63, %v6151_v53 }
 0x44c   :  { %v6161_v20 = vpop.f32.mrf.mxu0  ;;  %5029 = vmatprep.subr.mxu0 %v6288_v8 }
 0x44d   :  { %v6163_v48 = vpop.f32.mrf.mxu1  ;;  %5030 = vmatpush3.msra.mxu0 %v6288_v8 }
 0x44e   :  { %v6165_v56 = vpop.f32.mrf.mxu0 }
 0x44f   :  { %v6167_v35 = vpop.f32.mrf.mxu1 }
 0x450   :  { %v6169_v18 = vpop.f32.mrf.mxu0 }
 0x451   :  { %v6171_v32 = vpop.f32.mrf.mxu1 }
 0x452   :  { %v6173_v37 = vpop.f32.mrf.mxu0 }
 0x453   :  { %v6175_v29 = vpop.f32.mrf.mxu1 }
 0x454   :  { %v6177_v26 = vpop.f32.mrf.mxu0  ;;  %v2709_v11 = vadd.f32 %v6175_v29, %v6159_v12 }
 0x455   :  { %v6179_v34 = vpop.f32.mrf.mxu1 }
 0x456   :  { %v6181_v60 = vpop.f32.mrf.mxu0 }
 0x457   :  { %v6183_v49 = vpop.f32.mrf.mxu1 }
 0x458   :  { %v4927_v2 = vpop.f32.mrf.mxu0 }
 0x459   :  { %v6185_v55 = vpop.f32.mrf.mxu1  ;;  %v2838_v44 = vadd.f32 %v4927_v2, %v2691_v61  ;;  %v4137_v2 = vld [vmem:[%s6562_s4 + $0x50] sm:$0xff] }
 0x45a   :  { %v2830_v5 = vpop.f32.mrf.mxu0 }
 0x45b   :  { %v6187_v4 = vpop.f32.mrf.mxu1  ;;  %v2831_v53 = vadd.f32 %v2830_v5, %v2685_v16  ;;  %v3602_v5 = vsub.f32 %v6264_v21, %v6281_v19  ;;  %v6298_v16 = vand.u32 4294901760, %v4137_v2 }
 0x45c   :  { %v6189_v9 = vpop.f32.mrf.mxu0 }
 0x45d   :  { %v6191_v43 = vpop.f32.mrf.mxu1  ;;  %6849 = vst [vmem:[#allocation70_spill] sm:$0xff] %v6298_v16  ;;  %v3603_v21 = vand.u32 4294901760, %v3602_v5  ;;  %5031 = vmatprep.subr.mxu0 %v6298_v16 }
 0x45e   :  { %v6193_v31 = vpop.f32.mrf.mxu0  ;;  %5032 = vmatpush3.msra.mxu0 %v6298_v16 }
 0x45f   :  { %v6195_v25 = vpop.f32.mrf.mxu1  ;;  %5047 = vmatprep.subr.mxu1 %v3603_v21 }
 0x460   :  { %v6197_v1 = vpop.f32.mrf.mxu0  ;;  %5048 = vmatpush3.msra.mxu1 %v3603_v21 }
 0x461   :  { %v4953_v57 = vpop.f32.mrf.mxu1 }
 0x462   :  { %v6199_v42 = vpop.f32.mrf.mxu0  ;;  %v2993_v61 = vadd.f32 %v4953_v57, %v2838_v44  ;;  %v6307_v57 = vsub.f32 %v4138_v47, %v6288_v8  ;;  %v4136_v44 = vld [vmem:[%s6562_s4 + $0x48] sm:$0xff]  ;;  %v2715_v47 = vadd.f32 %v6171_v32, %v6157_v41 }
 0x463   :  { %v2984_v28 = vpop.f32.mrf.mxu1  ;;  %v6316_v38 = vand.u32 4294901760, %v4136_v44 }
 0x464   :  { %v6201_v46 = vpop.f32.mrf.mxu0  ;;  %v2985_v39 = vadd.f32 %v2984_v28, %v2831_v53  ;;  %v6314_v28 = vsub.f32 %v4137_v2, %v6298_v16  ;;  %v4135_v2 = vld [vmem:[%s6562_s4 + $0x40] sm:$0xff] }
 0x465   :  { %v6203_v59 = vpop.f32.mrf.mxu1  ;;  %v6334_v32 = vsub.f32 %v4136_v44, %v6316_v38  ;;  %5033 = vmatprep.subr.mxu0 %v6316_v38 }
 0x466   :  { %v6205_v17 = vpop.f32.mrf.mxu0  ;;  %v6331_v41 = vand.u32 4294901760, %v6314_v28  ;;  %5034 = vmatpush3.msra.mxu0 %v6316_v38 }
 0x467   :  { %v6207_v33 = vpop.f32.mrf.mxu1  ;;  %6854 = vst [vmem:[#allocation68_spill] sm:$0xff] %v6334_v32  ;;  %v6351_v12 = vand.u32 4294901760, %v6334_v32 }
 0x468   :  { %v6209_v3 = vpop.f32.mrf.mxu0  ;;  %6853 = vst [vmem:[#allocation67_spill] sm:$0xff] %v6331_v41  ;;  %v3623_v16 = vsub.f32 %v6314_v28, %v6331_v41 }
 0x469   :  { %v6211_v36 = vpop.f32.mrf.mxu1  ;;  %6855 = vst [vmem:[#allocation69_spill] sm:$0xff] %v6351_v12 }
 0x46a   :  { %v6213_v51 = vpop.f32.mrf.mxu0 }
 0x46b   :  { %v6215_v7 = vpop.f32.mrf.mxu1 }
 0x46c   :  { %v6220_v62 = vpop.f32.mrf.mxu0 }
 0x46d   :  { %v6224_v14 = vpop.f32.mrf.mxu1 }
 0x46e   :  { %v6229_v24 = vpop.f32.mrf.mxu0 }
 0x46f   :  { %v6237_v13 = vpop.f32.mrf.mxu1 }
 0x470   :  { %v4979_v23 = vpop.f32.mrf.mxu0 }
 0x471   :  { %v6252_v10 = vpop.f32.mrf.mxu1  ;;  %v3162_v52 = vadd.f32 %v4979_v23, %v2993_v61  ;;  %v6324_v23 = vand.u32 4294901760, %v6307_v57 }
 0x472   :  { %v3155_v40 = vpop.f32.mrf.mxu0 }
 0x473   :  { %v6268_v6 = vpop.f32.mrf.mxu1  ;;  %v3156_v53 = vadd.f32 %v3155_v40, %v2985_v39  ;;  %6852 = vst [vmem:[#allocation62_spill] sm:$0xff] %v6324_v23  ;;  %v6336_v40 = vand.u32 4294901760, %v4135_v2  ;;  %v2866_v39 = vadd.f32 %v6197_v1, %v2715_v47  ;;  %v2859_v1 = vadd.f32 %v6199_v42, %v2709_v11 }
 0x474   :  { %v6276_v22 = vpop.f32.mrf.mxu0  ;;  %v3624_v47 = vand.u32 4294901760, %v3623_v16 }
 0x475   :  { %v6283_v63 = vpop.f32.mrf.mxu1  ;;  %v6354_v29 = vsub.f32 %v4135_v2, %v6336_v40  ;;  %5035 = vmatprep.subr.mxu0 %v6336_v40  ;;  %v3017_v11 = vadd.f32 %v6215_v7, %v2859_v1 }
 0x476   :  { %6847 = vst [vmem:[#allocation60_spill] sm:$0xff] %v6283_v63  ;;  %v6294_v45 = vpop.f32.mrf.mxu0  ;;  %v6304_v63 = vand.u32 4294901760, %v6286_v58  ;;  %5036 = vmatpush3.msra.mxu0 %v6336_v40 }
 0x477   :  { %v6301_v0 = vpop.f32.mrf.mxu1  ;;  %v6366_v2 = vand.u32 4294901760, %v6354_v29  ;;  %5065 = vmatprep.subr.mxu0 %v6232_v54 }
 0x478   :  { %6850 = vst [vmem:[#allocation56_spill] sm:$0xff] %v6301_v0  ;;  %6851 = vst [vmem:[#allocation59_spill] sm:$0xff] %v6304_v63  ;;  %v4985_v19 = vpop.f32.mrf.mxu0  ;;  %v3609_v0 = vsub.f32 %v6286_v58, %v6304_v63 }
 0x479   :  { %v5005_v27 = vpop.f32.mrf.mxu1 }
 0x47a   :  { %v3303_v61 = vadd.f32 %v5005_v27, %v3162_v52  ;;  %v3179_v5 = vpop.f32.mrf.mxu0  ;;  %v3610_v27 = vand.u32 4294901760, %v3609_v0  ;;  %v3616_v52 = vsub.f32 %v6307_v57, %v6324_v23 }
 0x47b   :  { %v3296_v63 = vpop.f32.mrf.mxu1 }
 0x47c   :  { %v3297_v58 = vadd.f32 %v3296_v63, %v3156_v53  ;;  %3372 = vrot.lane.b32.xlu1 %v3303_v61, %s5156_s20  ;;  %v6346_v44 = vpop.f32.mrf.mxu0  ;;  %5049 = vmatprep.subr.mxu1 %v3610_v27  ;;  %v3617_v21 = vand.u32 4294901760, %v3616_v52  ;;  %v3025_v63 = vadd.f32 %v6211_v36, %v2866_v39  ;;  %v3630_v53 = vsub.f32 %v6334_v32, %v6351_v12 }
 0x47d   :  { %v6358_v0 = vpop.f32.mrf.mxu1  ;;  %5050 = vmatpush3.msra.mxu1 %v3610_v27  ;;  %v2739_v39 = vadd.f32 %v6185_v55, %v6169_v18  ;;  %v3180_v27 = vadd.f32 %v3179_v5, %v3017_v11  ;;  %v2703_v18 = vadd.f32 %v6163_v48, %v6153_v50  ;;  %v2727_v50 = vadd.f32 %v6179_v34, %v6161_v20 }
 0x47e   :  { %3370 = vrot.lane.b32.xlu0 %v3297_v58, %s5156_s20  ;;  %v6368_v61 = vpop.f32.mrf.mxu0  ;;  %5051 = vmatprep.subr.mxu1 %v3617_v21  ;;  %v3186_v52 = vadd.f32 %v4985_v19, %v3025_v63  ;;  %v3631_v36 = vand.u32 4294901760, %v3630_v53  ;;  %v3637_v58 = vsub.f32 %v6354_v29, %v6366_v2  ;;  %v2733_v19 = vadd.f32 %v6187_v4, %v6173_v37 }
 0x47f   :  { %v3308_v42 = vpop.f32.mrf.mxu1  ;;  %5052 = vmatpush3.msra.mxu1 %v3617_v21  ;;  %v2894_v7 = vadd.f32 %v6209_v3, %v2739_v39  ;;  %v2697_v4 = vadd.f32 %v6167_v35, %v6155_v15  ;;  %v2852_v3 = vadd.f32 %v6189_v9, %v2703_v18  ;;  %v2721_v53 = vadd.f32 %v6183_v49, %v6165_v56  ;;  %v6859_v18 = vld [vmem:[#allocation63_spill] sm:$0xff] }
 0x480   :  { %5053 = vmatprep.subr.mxu1 %v3624_v47  ;;  %v3638_v41 = vand.u32 4294901760, %v3637_v58  ;;  %v4991_v23 = vpop.f32.mrf.mxu0  ;;  %v2887_v55 = vadd.f32 %v6213_v51, %v2733_v19  ;;  %v2880_v15 = vadd.f32 %v6201_v46, %v2727_v50  ;;  %v2751_v20 = vadd.f32 %v6191_v43, %v6177_v26  ;;  %v6858_v19 = vld [vmem:[#allocation54_spill] sm:$0xff] }
 0x481   :  { %v5011_v16 = vpop.f32.mrf.mxu1  ;;  %5054 = vmatpush3.msra.mxu1 %v3624_v47  ;;  %v3057_v5 = vadd.f32 %v6252_v10, %v2894_v7  ;;  %v2845_v51 = vadd.f32 %v6193_v31, %v2697_v4  ;;  %v3009_v10 = vadd.f32 %v6203_v59, %v2852_v3  ;;  %v2873_v34 = vadd.f32 %v6205_v17, %v2721_v53 }
 0x482   :  { %v3327_v12 = vadd.f32 %v5011_v16, %v3186_v52  ;;  %5055 = vmatprep.subr.mxu1 %v3631_v36  ;;  %v3203_v63 = vpop.f32.mrf.mxu0  ;;  %v3041_v31 = vadd.f32 %v6224_v14, %v2880_v15  ;;  %v2745_v49 = vadd.f32 %v6195_v25, %v6181_v60  ;;  %v6857_v25 = vld [vmem:[#allocation56_spill] sm:$0xff] }
 0x483   :  { %v3320_v32 = vpop.f32.mrf.mxu1  ;;  %5056 = vmatpush3.msra.mxu1 %v3631_v36  ;;  %v3001_v35 = vadd.f32 %v6207_v33, %v2845_v51  ;;  %v2908_v33 = vadd.f32 %v6220_v62, %v2751_v20 }
 0x484   :  { %v3321_v1 = vadd.f32 %v3320_v32, %v3180_v27  ;;  %3388 = vrot.lane.b32.xlu1 %v3327_v12, %s5157_s21  ;;  %5057 = vmatprep.subr.mxu1 %v3638_v41  ;;  %v3049_v32 = vadd.f32 %v6268_v6, %v2887_v55  ;;  %v3210_v12 = vadd.f32 %v4991_v23, %v3057_v5  ;;  %v4994_v46 = vpop.f32.mrf.mxu0 }
 0x485   :  { %v5014_v21 = vpop.f32.mrf.mxu1  ;;  %5058 = vmatpush3.msra.mxu1 %v3638_v41  ;;  %v3174_v6 = vadd.f32 %v6276_v22, %v3009_v10  ;;  %v3168_v59 = vadd.f32 %v6294_v45, %v3001_v35  ;;  %v3033_v22 = vadd.f32 %v6237_v13, %v2873_v34  ;;  %v3198_v26 = vadd.f32 %v6346_v44, %v3041_v31  ;;  %v6856_v45 = vld [vmem:[#allocation60_spill] sm:$0xff]  ;;  %v6860_v35 = vld [vmem:[#allocation55_spill] sm:$0xff] }
 0x486   :  { %3386 = vrot.lane.b32.xlu0 %v3321_v1, %s5157_s21  ;;  %5087 = vmatprep.subr.mxu1 %v6222_v30  ;;  %v3204_v41 = vadd.f32 %v3203_v63, %v3049_v32  ;;  %v2901_v14 = vadd.f32 %v6229_v24, %v2745_v49  ;;  %v3073_v23 = vadd.f32 %v6856_v45, %v2908_v33  ;;  %v3215_v60 = vpop.f32.mrf.mxu0  ;;  %v6863_v49 = vld [vmem:[#allocation11_spill] sm:$0xff] }
 0x487   :  { %v3332_v37 = vpop.f32.mrf.mxu1  ;;  %v3315_v56 = vadd.f32 %v6358_v0, %v3174_v6  ;;  %v3309_v43 = vadd.f32 %v3308_v42, %v3168_v59  ;;  %v3192_v0 = vadd.f32 %v6368_v61, %v3033_v22  ;;  %v3339_v52 = vadd.f32 %v5014_v21, %v3198_v26  ;;  %v6862_v59 = vld [vmem:[#allocation18_spill] sm:$0xff] }
 0x488   :  { %v3065_v62 = vadd.f32 %v6857_v25, %v2901_v14  ;;  %v3222_v36 = vadd.f32 %v4994_v46, %v3073_v23  ;;  %v6864_v14 = vld [vmem:[#allocation57_spill] sm:$0xff] }
 0x489   :  { %v5017_v48 = vpop.f32.mrf.mxu1  ;;  %v3333_v13 = vadd.f32 %v3332_v37, %v3192_v0 }
 0x48a   :  { %v3351_v47 = vadd.f32 %v5017_v48, %v3210_v12  ;;  %v3216_v42 = vadd.f32 %v3215_v60, %v3065_v62  ;;  %v6865_v62 = vld [vmem:[#allocation58_spill] sm:$0xff] }
 0x48b   :  { %v3344_v11 = vpop.f32.mrf.mxu1 }
 0x48c   :  { %v3345_v9 = vadd.f32 %v3344_v11, %v3204_v41  ;;  %3404 = vrot.lane.b32.xlu1 %v3351_v47, %s5158_s22 }
 0x48d   :  { %v5020_v17 = vpop.f32.mrf.mxu1 }
 0x48e   :  { %3402 = vrot.lane.b32.xlu0 %v3345_v9, %s5158_s22  ;;  %v3363_v58 = vadd.f32 %v5020_v17, %v3222_v36  ;;  %v6861_v9 = vld [vmem:[#allocation9_spill] sm:$0xff]  ;;  %v6866_v36 = vld [vmem:[#allocation70_spill] sm:$0xff] }
 0x48f   :  { %v3356_v44 = vpop.f32.mrf.mxu1 }
 0x490   :  { %3376 = vrot.lane.b32.xlu1 %v3315_v56, %s5156_s20  ;;  %v3357_v24 = vadd.f32 %v3356_v44, %v3216_v42  ;;  %v6867_v44 = vld [vmem:[#allocation65_spill] sm:$0xff] }
 0x492   :  { %3374 = vrot.lane.b32.xlu0 %v3309_v43, %s5156_s20 }
 0x494   :  { %3392 = vrot.lane.b32.xlu1 %v3339_v52, %s5157_s21 }
 0x496   :  { %3390 = vrot.lane.b32.xlu0 %v3333_v13, %s5157_s21 }
 0x498   :  { %3408 = vrot.lane.b32.xlu1 %v3363_v58, %s5158_s22  ;;  %v6868_v58 = vld [vmem:[#allocation64_spill] sm:$0xff] }
 0x49a   :  { %3406 = vrot.lane.b32.xlu0 %v3357_v24, %s5158_s22 }
 0x4ee   :  { %v3373_v61 = vpop.permute.xlu1 %3372 }
 0x4ef   :  { %v3415_v7 = vsel %vm1696_vm3, %v6858_v19, %v3373_v61  ;;  %v6876_v19 = vld [vmem:[#allocation69_spill] sm:$0xff] }
 0x4f0   :  { %v3371_v16 = vpop.permute.xlu0 %3370 }
 0x4f1   :  { %v3414_v55 = vsel %vm1696_vm3, %v6859_v18, %v3371_v16 }
 0x4f6   :  { %v3389_v39 = vpop.permute.xlu1 %3388 }
 0x4f7   :  { %v3419_v1 = vsel %vm653_vm2, %v3415_v7, %v3389_v39 }
 0x4f8   :  { %v3387_v27 = vpop.permute.xlu0 %3386 }
 0x4f9   :  { %v3418_v63 = vsel %vm653_vm2, %v3414_v55, %v3387_v27  ;;  %v6869_v27 = vld [vmem:[#allocation68_spill] sm:$0xff] }
 0x4fe   :  { %v3405_v21 = vpop.permute.xlu1 %3404 }
 0x4ff   :  { %v3423_v5 = vsel %vm1705_vm4, %v3419_v1, %v3405_v21 }
 0x500   :  { %v3447_v37 = vsel %vm1725_vm5, %v3423_v5, 0  ;;  %v3403_v4 = vpop.permute.xlu0 %3402 }
 0x501   :  { %v6431_v3 = vand.u32 4294901760, %v3447_v37  ;;  %v3422_v32 = vsel %vm1705_vm4, %v3418_v63, %v3403_v4  ;;  %v4144_v4 = vld [vmem:[%s6563_s5 + $0x1] ss:$0 sm:$0xff] }
 0x502   :  { %v3444_v12 = vsel %vm1725_vm5, %v3422_v32, 0  ;;  %v3377_v50 = vpop.permute.xlu1 %3376 }
 0x503   :  { %v6436_v48 = vsub.f32 %v3447_v37, %v6431_v3  ;;  %v6438_v51 = vand.u32 4294901760, %v3444_v12  ;;  %v3417_v20 = vsel %vm1696_vm3, %v6861_v9, %v3377_v50 }
 0x504   :  { %v3375_v10 = vpop.permute.xlu0 %3374 }
 0x505   :  { %v3540_v41 = vand.u32 4294901760, %v6436_v48  ;;  %v6442_v47 = vsub.f32 %v3444_v12, %v6438_v51  ;;  %5059 = vmatprep.mubr.f32.mxu1 %v6438_v51  ;;  %v3416_v46 = vsel %vm1696_vm3, %v6863_v49, %v3375_v10 }
 0x506   :  { %v3393_v53 = vpop.permute.xlu1 %3392  ;;  %5060 = vmatmul.mubr.f32.vlgmr.msra.gmra.mxu1 %v6431_v3 }
 0x507   :  { %5088 = vmatpush3.msra.mxu1 %v6222_v30  ;;  %v3530_v11 = vand.u32 4294901760, %v6442_v47  ;;  %v3541_v15 = vsub.f32 %v6436_v48, %v3540_v41  ;;  %v3421_v31 = vsel %vm653_vm2, %v3417_v20, %v3393_v53 }
 0x508   :  { %5089 = vmatprep.subr.mxu1 %v6860_v35  ;;  %v3391_v6 = vpop.permute.xlu0 %3390 }
 0x509   :  { %5090 = vmatpush3.msra.mxu1 %v6860_v35  ;;  %v3531_v34 = vsub.f32 %v6442_v47, %v3530_v11  ;;  %v3542_v26 = vand.u32 4294901760, %v3541_v15  ;;  %v3420_v43 = vsel %vm653_vm2, %v3416_v46, %v3391_v6 }
 0x50a   :  { %5091 = vmatprep.subr.mxu1 %v6862_v59  ;;  %v3409_v56 = vpop.permute.xlu1 %3408 }
 0x50b   :  { %v3425_v33 = vsel %vm1705_vm4, %v3421_v31, %v3409_v56  ;;  %5092 = vmatpush3.msra.mxu1 %v6862_v59  ;;  %v3532_v22 = vand.u32 4294901760, %v3531_v34 }
 0x50c   :  { %v3453_v17 = vsel %vm1725_vm5, %v3425_v33, 0  ;;  %5093 = vmatprep.subr.mxu1 %v6864_v14  ;;  %v3407_v45 = vpop.permute.xlu0 %3406 }
 0x50d   :  { %v6463_v23 = vand.u32 4294901760, %v3453_v17  ;;  %5094 = vmatpush3.msra.mxu1 %v6864_v14  ;;  %v3424_v0 = vsel %vm1705_vm4, %v3420_v43, %v3407_v45  ;;  %5037 = vmatprep.mubr.f32.mxu0 %v3532_v22 }
 0x50e   :  { %v3450_v52 = vsel %vm1725_vm5, %v3424_v0, 0  ;;  %5095 = vmatprep.subr.mxu1 %v6288_v8  ;;  %5038 = vmatmul.mubr.f32.vlgmr.msra.gmra.mxu0 %v3542_v26 }
 0x50f   :  { %v6469_v60 = vand.u32 4294901760, %v3450_v52  ;;  %5066 = vmatpush3.msra.mxu0 %v6232_v54  ;;  %5096 = vmatpush3.msra.mxu1 %v6288_v8  ;;  %v3559_v25 = vsub.f32 %v3453_v17, %v6463_v23 }
 0x510   :  { %5067 = vmatprep.subr.mxu0 %v6865_v62  ;;  %5097 = vmatprep.subr.mxu1 %v6866_v36 }
 0x511   :  { %v3549_v13 = vsub.f32 %v3450_v52, %v6469_v60  ;;  %5068 = vmatpush3.msra.mxu0 %v6865_v62  ;;  %5098 = vmatpush3.msra.mxu1 %v6866_v36  ;;  %v3560_v42 = vand.u32 4294901760, %v3559_v25 }
 0x512   :  { %5062 = vmatprep.mubr.f32.mxu1 %v6469_v60  ;;  %5069 = vmatprep.subr.mxu0 %v6867_v44 }
 0x513   :  { %5099 = vmatprep.subr.mxu1 %v6316_v38  ;;  %5063 = vmatmul.mubr.f32.gmra.mxu1 %v6463_v23  ;;  %v3550_v54 = vand.u32 4294901760, %v3549_v13  ;;  %v3561_v16 = vsub.f32 %v3559_v25, %v3560_v42 }
 0x514   :  { %5070 = vmatpush3.msra.mxu0 %v6867_v44  ;;  %5100 = vmatpush3.msra.mxu1 %v6316_v38 }
 0x515   :  { %5071 = vmatprep.subr.mxu0 %v6868_v58  ;;  %5101 = vmatprep.subr.mxu1 %v6336_v40  ;;  %v3551_v24 = vsub.f32 %v3549_v13, %v3550_v54  ;;  %v3562_v39 = vand.u32 4294901760, %v3561_v16 }
 0x516   :  { %5103 = vmatprep.mubr.f32.mxu1 %v3530_v11  ;;  %5072 = vmatpush3.msra.mxu0 %v6868_v58 }
 0x517   :  { %5102 = vmatpush3.msra.mxu1 %v6336_v40  ;;  %5073 = vmatprep.subr.mxu0 %v6307_v57  ;;  %v3552_v61 = vand.u32 4294901760, %v3551_v24 }
 0x518   :  { %5131 = vmatprep.subr.mxu1 %v6222_v30  ;;  %5074 = vmatpush3.msra.mxu0 %v6307_v57  ;;  %v6871_v57 = vld [vmem:[#allocation61_spill] sm:$0xff] }
 0x519   :  { %5104 = vmatmul.mubr.f32.vlgmr.msra.gmra.mxu1 %v3540_v41  ;;  %5075 = vmatprep.subr.mxu0 %v6314_v28 }
 0x51a   :  { %5132 = vmatpush3.msra.mxu1 %v6222_v30  ;;  %5106 = vmatprep.mubr.f32.mxu1 %v3550_v54  ;;  %v6870_v30 = vld [vmem:[#allocation15_spill] sm:$0xff] }
 0x51b   :  { %5133 = vmatprep.subr.mxu1 %v6860_v35  ;;  %5076 = vmatpush3.msra.mxu0 %v6314_v28  ;;  %v6872_v28 = vld [vmem:[#allocation66_spill] sm:$0xff] }
 0x51c   :  { %5134 = vmatpush3.msra.mxu1 %v6860_v35  ;;  %5040 = vmatprep.mubr.f32.mxu0 %v3552_v61 }
 0x51d   :  { %5077 = vmatprep.subr.mxu0 %v6869_v27  ;;  %5135 = vmatprep.subr.mxu1 %v6862_v59 }
 0x51e   :  { %5041 = vmatmul.mubr.f32.gmra.mxu0 %v3562_v39  ;;  %5107 = vmatmul.mubr.f32.gmra.mxu1 %v3560_v42 }
 0x51f   :  { %5078 = vmatpush3.msra.mxu0 %v6869_v27  ;;  %5136 = vmatpush3.msra.mxu1 %v6862_v59 }
 0x520   :  { %5079 = vmatprep.subr.mxu0 %v6354_v29  ;;  %5081 = vmatprep.mubr.f32.mxu0 %v6442_v47 }
 0x521   :  { %5137 = vmatprep.subr.mxu1 %v6864_v14  ;;  %5147 = vmatprep.mubr.f32.mxu1 %v6438_v51 }
 0x522   :  { %5080 = vmatpush3.msra.mxu0 %v6354_v29  ;;  %5138 = vmatpush3.msra.mxu1 %v6864_v14  ;;  %v6874_v29 = vld [vmem:[#allocation62_spill] sm:$0xff] }
 0x523   :  { %5109 = vmatprep.subr.mxu0 %v6870_v30  ;;  %5139 = vmatprep.subr.mxu1 %v6288_v8 }
 0x524   :  { %5082 = vmatmul.mubr.f32.vlgmr.msra.gmra.mxu0 %v6436_v48  ;;  %5140 = vmatpush3.msra.mxu1 %v6288_v8  ;;  %v6873_v8 = vld [vmem:[#allocation59_spill] sm:$0xff] }
 0x525   :  { %5110 = vmatpush3.msra.mxu0 %v6870_v30  ;;  %5084 = vmatprep.mubr.f32.mxu0 %v3549_v13 }
 0x526   :  { %5111 = vmatprep.subr.mxu0 %v6871_v57  ;;  %5141 = vmatprep.subr.mxu1 %v6866_v36 }
 0x527   :  { %5112 = vmatpush3.msra.mxu0 %v6871_v57  ;;  %5142 = vmatpush3.msra.mxu1 %v6866_v36 }
 0x528   :  { %5113 = vmatprep.subr.mxu0 %v6872_v28  ;;  %5143 = vmatprep.subr.mxu1 %v6316_v38 }
 0x529   :  { %5085 = vmatmul.mubr.f32.gmra.mxu0 %v3559_v25  ;;  %5144 = vmatpush3.msra.mxu1 %v6316_v38  ;;  %v6875_v38 = vld [vmem:[#allocation67_spill] sm:$0xff] }
 0x52a   :  { %5114 = vmatpush3.msra.mxu0 %v6872_v28  ;;  %5125 = vmatprep.mubr.f32.mxu0 %v6438_v51 }
 0x52b   :  { %5115 = vmatprep.subr.mxu0 %v6873_v8  ;;  %5145 = vmatprep.subr.mxu1 %v6336_v40 }
 0x52c   :  { %5116 = vmatpush3.msra.mxu0 %v6873_v8  ;;  %5146 = vmatpush3.msra.mxu1 %v6336_v40 }
 0x52d   :  { %5117 = vmatprep.subr.mxu0 %v6874_v29  ;;  %5148 = vmatmul.mubr.f32.vlgmr.msra.gmra.mxu1 %v6431_v3 }
 0x52e   :  { %5118 = vmatpush3.msra.mxu0 %v6874_v29  ;;  %5150 = vmatprep.mubr.f32.mxu1 %v6469_v60 }
 0x52f   :  { %5119 = vmatprep.subr.mxu0 %v6875_v38 }
 0x530   :  { %5120 = vmatpush3.msra.mxu0 %v6875_v38 }
 0x531   :  { %5121 = vmatprep.subr.mxu0 %v6876_v19  ;;  %5151 = vmatmul.mubr.f32.gmra.mxu1 %v6463_v23 }
 0x532   :  { %5122 = vmatpush3.msra.mxu0 %v6876_v19 }
 0x533   :  { %5123 = vmatprep.subr.mxu0 %v6366_v2 }
 0x534   :  { %5124 = vmatpush3.msra.mxu0 %v6366_v2 }
 0x535   :  { %5126 = vmatmul.mubr.f32.vlgmr.msra.gmra.mxu0 %v6431_v3 }
 0x536   :  { %5128 = vmatprep.mubr.f32.mxu0 %v6469_v60 }
 0x539   :  { %5129 = vmatmul.mubr.f32.gmra.mxu0 %v6463_v23 }
 0x5c6   :  { %v5061_v40 = vpop.f32.mrf.mxu1 }
 0x5c8   :  { %v3675_v7 = vpop.f32.mrf.mxu1 }
 0x5ce   :  { %v5039_v1 = vpop.f32.mrf.mxu0 }
 0x5cf   :  { %v3545_v3 = vadd.f32 %v5039_v1, %v4144_v4 }
 0x5d0   :  { %v3534_v18 = vpop.f32.mrf.mxu0 }
 0x5d1   :  { %v3535_v48 = vadd.f32 %v4144_v4, %v3534_v18  ;;  %v3682_v10 = vadd.f32 %v5061_v40, %v3545_v3 }
 0x5d3   :  { %v5064_v21 = vpop.f32.mrf.mxu1  ;;  %v3676_v15 = vadd.f32 %v3675_v7, %v3535_v48 }
 0x5d5   :  { %v3687_v55 = vpop.f32.mrf.mxu1 }
 0x5d9   :  { %v5105_v63 = vpop.f32.mrf.mxu1 }
 0x5db   :  { %v3883_v2 = vpop.f32.mrf.mxu1 }
 0x5de   :  { %v5042_v5 = vpop.f32.mrf.mxu0  ;;  %v5108_v12 = vpop.f32.mrf.mxu1 }
 0x5df   :  { %v3565_v51 = vadd.f32 %v5042_v5, %v4144_v4 }
 0x5e0   :  { %v3554_v37 = vpop.f32.mrf.mxu0  ;;  %v3899_v41 = vpop.f32.mrf.mxu1 }
 0x5e1   :  { %v3555_v53 = vadd.f32 %v4144_v4, %v3554_v37  ;;  %v3694_v9 = vadd.f32 %v5064_v21, %v3565_v51 }
 0x5e3   :  { %v3688_v31 = vadd.f32 %v3687_v55, %v3555_v53 }
 0x5e4   :  { %v5083_v32 = vpop.f32.mrf.mxu0 }
 0x5e5   :  { %v3789_v11 = vadd.f32 %v5083_v32, %v3682_v10 }
 0x5e6   :  { %v3781_v50 = vpop.f32.mrf.mxu0 }
 0x5e7   :  { %v3782_v6 = vadd.f32 %v3781_v50, %v3676_v15  ;;  %v3892_v59 = vadd.f32 %v5105_v63, %v3789_v11 }
 0x5e9   :  { %v5086_v47 = vpop.f32.mrf.mxu0  ;;  %v3884_v22 = vadd.f32 %v3883_v2, %v3782_v6 }
 0x5ea   :  { %v3803_v34 = vadd.f32 %v5086_v47, %v3694_v9 }
 0x5eb   :  { %v3795_v20 = vpop.f32.mrf.mxu0 }
 0x5ec   :  { %v3796_v46 = vadd.f32 %v3795_v20, %v3688_v31  ;;  %v3908_v14 = vadd.f32 %v5108_v12, %v3803_v34 }
 0x5ed   :  { %v5149_v35 = vpop.f32.mrf.mxu1 }
 0x5ee   :  { %v3900_v25 = vadd.f32 %v3899_v41, %v3796_v46 }
 0x5ef   :  { %v4099_v56 = vpop.f32.mrf.mxu1 }
 0x5f1   :  { %v5152_v45 = vpop.f32.mrf.mxu1 }
 0x5f3   :  { %v4111_v54 = vpop.f32.mrf.mxu1 }
 0x5f5   :  { %v5127_v49 = vpop.f32.mrf.mxu0 }
 0x5f6   :  { %v4009_v33 = vadd.f32 %v5127_v49, %v3892_v59 }
 0x5f7   :  { %v4002_v26 = vpop.f32.mrf.mxu0 }
 0x5f8   :  { %v4106_v43 = vadd.f32 %v5149_v35, %v4009_v33  ;;  %v4003_v17 = vadd.f32 %v4002_v26, %v3884_v22 }
 0x5f9   :  { %v5130_v23 = vpop.f32.mrf.mxu0 }
 0x5fa   :  { %v4122_v0 = vmax.f32 %v4106_v43, 0.0  ;;  %v4100_v52 = vadd.f32 %v4099_v56, %v4003_v17  ;;  %v4021_v60 = vadd.f32 %v5130_v23, %v3908_v14 }
 0x5fb   :  { %v4014_v62 = vpop.f32.mrf.mxu0 }
 0x5fc   :  { %4126 = vst.msk [vmem:[%s6564_s6 + $0x8] sm:$0xff] %vm1696_vm3, %v4122_v0  ;;  %v4121_v36 = vmax.f32 %v4100_v52, 0.0  ;;  %v4118_v13 = vadd.f32 %v5152_v45, %v4021_v60  ;;  %v4015_v44 = vadd.f32 %v4014_v62, %v3900_v25 }
 0x5fe   :  { %4125 = vst.msk [vmem:[%s6564_s6] sm:$0xff] %vm1696_vm3, %v4121_v36  ;;  %v4124_v42 = vmax.f32 %v4118_v13, 0.0  ;;  %v4112_v58 = vadd.f32 %v4111_v54, %v4015_v44 }
 0x600   :  { %4128 = vst.msk [vmem:[%s6564_s6 + $0x18] sm:$0xff] %vm1696_vm3, %v4124_v42  ;;  %v4123_v24 = vmax.f32 %v4112_v58, 0.0 }
 0x602   :  { %4127 = vst.msk [vmem:[%s6564_s6 + $0x10] sm:$0xff] %vm1696_vm3, %v4123_v24 }

</bundles_post_ra>
